<compile_context>
chip_gen: v6e
topology: v6e:2x2x1
jax: 0.10.0
libtpu: 0.0.40
codegen_flags: <defaults>
</compile_context>

<pallas_src>
import jax
import jax.numpy as jnp
from jax import lax
from jax.experimental import pallas as pl
from jax.experimental.pallas import tpu as pltpu

# ----------------------------- config ---------------------------------------
VOCAB = 20
GOAL_TYPES = 6
EMBED = 32
HIDDEN = 32
OUTPUT = 8
OUT_PAD = 128          # lane-dense padded head output; sliced to OUTPUT in the wrapper
FC1 = 128              # 64 * 2
BATCH = 2
SEQ = 8
PAD_IDX = 0
VOCAB_PAD = 32         # one-hot / table padding (lookup fused in-kernel)
GOAL_PAD = 8
# bidirectional=False -> input_size_factor = 1 ; n_layers = 1 ; dropout = 0.0
# TODO(synk): dropout_probability fixed at 0.0 (F.dropout identity); nonzero training
#             dropout would need pltpu.prng_* inside the kernel.
# TODO(synk): reference init_hidden() resamples orthogonal/kaiming h0,c0 every forward;
#             here they are deterministic parameters fixed at init time.

# slab row offsets (all multiples of 8 so in-kernel static views stay tile aligned)
ROW_TOKPROJ = 0        # (VOCAB_PAD, 4H)  pad(text_emb) @ W_ih^T
ROW_LSTM_B = 32        # (1, 4H)          b_ih + b_hh
ROW_WHH = 40           # (H, 4H)          W_hh^T
ROW_GOALPROJ = 72      # (GOAL_PAD, H)    pad(goal_emb) @ W_proj^T / H  (1/H logit scale folded)
ROW_PROJB = 80         # (1, H)           b_proj / H
ROW_FC1W = 88          # (2H, FC1)        first_fc1 W^T
ROW_FC1B = 152         # (1, FC1)
ROW_FC2W = 160         # (FC1, OUT_PAD)   first_fc2 W^T (lane padded)
ROW_FC2B = 288         # (1, OUT_PAD)
ROW_H0 = 296           # (B, H)
ROW_C0 = 304           # (B, H)
SLAB_ROWS = 312


# --------------- fused embed + LSTM + attention + MLP kernel -----------------
def rnn_fused_kernel(len_ref, ids_ref, w_ref, o_ref):
    B, T, H = BATCH, SEQ, HIDDEN

    # row index -> (timestep, sample) helpers; B is a compile-time constant, use bit
    # ops when it is a power of two so no vector integer division is emitted.
    if B & (B - 1) == 0:
        _sh = B.bit_length() - 1
        _div = lambda x: jnp.right_shift(x, _sh)
        _mod = lambda x: jnp.bitwise_and(x, B - 1)
    else:
        _div = lambda x: x // B
        _mod = lambda x: x % B

    # ---- static views into the packed constant slab (no extra DMAs) ----------
    tokproj = w_ref[ROW_TOKPROJ:ROW_TOKPROJ + VOCAB_PAD, :]        # (Vp, 4H)
    lstm_b = w_ref[ROW_LSTM_B:ROW_LSTM_B + 1, :]                   # (1, 4H)
    whh = w_ref[ROW_WHH:ROW_WHH + H, :]                            # (H, 4H)
    goalprj = w_ref[ROW_GOALPROJ:ROW_GOALPROJ + GOAL_PAD, 0:H]     # (Gp, H), pre-scaled 1/H
    projb = w_ref[ROW_PROJB:ROW_PROJB + 1, 0:H]                    # (1, H),  pre-scaled 1/H
    fc1w = w_ref[ROW_FC1W:ROW_FC1W + 2 * H, :]                     # (2H, FC1)
    fc1b = w_ref[ROW_FC1B:ROW_FC1B + 1, :]                         # (1, FC1)
    fc2w = w_ref[ROW_FC2W:ROW_FC2W + FC1, :]                       # (FC1, OUT_PAD)
    fc2b = w_ref[ROW_FC2B:ROW_FC2B + 1, :]                         # (1, OUT_PAD)
    h = w_ref[ROW_H0:ROW_H0 + B, 0:H]                              # (B, H)
    c = w_ref[ROW_C0:ROW_C0 + B, 0:H]                              # (B, H)

    # ---- fused embedding lookup + hoisted LSTM input projection --------------
    # rows of ids / x_proj / outs are time-major: r = t*B + b
    tok = ids_ref[0:T * B, :]                                      # (T*B, 1) int32
    onehot_tok = (tok == lax.broadcasted_iota(jnp.int32, (T * B, VOCAB_PAD), 1)
                  ).astype(jnp.float32)
    x_proj = jnp.dot(onehot_tok, tokproj,
                     preferred_element_type=jnp.float32) + lstm_b  # (T*B, 4H)

    gid = ids_ref[T * B:T * B + 2 * B, :]                          # (2B,1): [f_0..f_B-1, l_0..l_B-1]
    onehot_goal = (gid == lax.broadcasted_iota(jnp.int32, (2 * B, GOAL_PAD), 1)
                   ).astype(jnp.float32)
    q = jnp.dot(onehot_goal, goalprj,
                preferred_element_type=jnp.float32) + projb        # (2B, H), already scaled by 1/H

    # ---- LSTM recurrence: batched over B, fully unrolled over T --------------
    # bf16 MXU operands on the serial h @ W_hh chain; cell state & gate math stay f32.
    whh_bf = whh.astype(jnp.bfloat16)
    hs = []
    for t in range(T):
        gates = x_proj[t * B:(t + 1) * B, :] + jnp.dot(
            h.astype(jnp.bfloat16), whh_bf, preferred_element_type=jnp.float32)  # (B,4H)
        sig = jax.nn.sigmoid(gates)                 # one EUP pass over the whole gates vreg
        i_g = sig[:, 0 * H:1 * H]
        f_g = sig[:, 1 * H:2 * H]
        o_g = sig[:, 3 * H:4 * H]
        g_g = jnp.tanh(gates[:, 2 * H:3 * H])
        c = f_g * c + i_g * g_g
        h = o_g * jnp.tanh(c)
        hs.append(h)
    # NOTE: h/c keep running past each sample's length; harmless because only the
    # length-masked `outs` below are consumed (the final hidden/cell state is unused).
    outs = jnp.concatenate(hs, axis=0)              # (T*B, H), row = t*B + b

    # ---- pad_packed_sequence semantics: zero outputs past each sample length --
    r_io = lax.broadcasted_iota(jnp.int32, (T * B, 1), 0)
    r_t, r_b = _div(r_io), _mod(r_io)
    lens_rows = jnp.zeros((T * B, 1), jnp.int32)
    for b in range(B):
        lens_rows = jnp.where(r_b == b, len_ref[b], lens_rows)
    outs = outs * (r_t < lens_rows).astype(jnp.float32)

    # ---- batched dot-attention (block-diagonal over samples) ------------------
    # logits[i, j]: query i (sample i % B) vs key row j (sample j % B, step j // B)
    logits = lax.dot_general(q, outs, (((1,), (1,)), ((), ())),
                             preferred_element_type=jnp.float32)    # (2B, T*B)
    c_io = lax.broadcasted_iota(jnp.int32, (2 * B, T * B), 1)
    c_t, c_b = _div(c_io), _mod(c_io)
    row_b = _mod(lax.broadcasted_iota(jnp.int32, (2 * B, T * B), 0))
    lens_cols = jnp.zeros((2 * B, T * B), jnp.int32)
    for b in range(B):
        lens_cols = jnp.where(c_b == b, len_ref[b], lens_cols)
    invalid = jnp.logical_or(c_b != row_b, c_t >= lens_cols)
    logits = logits + jnp.where(invalid, -1e9, 0.0)
    logits = logits - jnp.max(logits, axis=-1, keepdims=True)
    ew = jnp.exp(logits)
    w_att = ew * pl.reciprocal(jnp.sum(ew, axis=-1, keepdims=True), approx=True)
    wm = jnp.dot(w_att, outs, preferred_element_type=jnp.float32)   # (2B, H)

    # ---- MLP head: cat([first,final],-1) @ W1 == first @ W1[:H] + final @ W1[H:] ----
    x1 = (jnp.dot(wm[0:B, :], fc1w[0:H, :], preferred_element_type=jnp.float32)
          + jnp.dot(wm[B:2 * B, :], fc1w[H:2 * H, :], preferred_element_type=jnp.float32)
          + fc1b)
    x1 = jnp.maximum(x1, 0.0)
    o_ref[...] = jnp.dot(x1, fc2w, preferred_element_type=jnp.float32) + fc2b  # (B, OUT_PAD)


def run_rnn_fused(lengths, ids, w_slab):
    n_ids = ids.shape[0]
    return pl.pallas_call(
        rnn_fused_kernel,
        out_shape=jax.ShapeDtypeStruct((BATCH, OUT_PAD), jnp.float32),
        grid_spec=pltpu.PrefetchScalarGridSpec(
            num_scalar_prefetch=1,
            grid=(1,),
            in_specs=[
                pl.BlockSpec((n_ids, 1), lambda i, lens: (0, 0)),         # packed int ids
                pl.BlockSpec((SLAB_ROWS, 128), lambda i, lens: (0, 0)),   # packed weight slab
            ],
            out_specs=pl.BlockSpec((BATCH, OUT_PAD), lambda i, lens: (0, 0)),
        ),
        compiler_params=pltpu.CompilerParams(
            dimension_semantics=("arbitrary",)),
    )(lengths, ids, w_slab)


# ----------------------------- parameters ------------------------------------
def init_params(key):
    ks = jax.random.split(key, 11)
    text_emb = jax.random.normal(ks[0], (VOCAB, EMBED), jnp.float32)
    goal_emb = jax.random.normal(ks[1], (GOAL_TYPES, EMBED), jnp.float32)

    # LSTM (PyTorch gate order i,f,g,o), stored transposed for x @ W^T
    s = 1.0 / jnp.sqrt(HIDDEN)
    wih_t = jax.random.uniform(ks[2], (EMBED, 4 * HIDDEN), jnp.float32, -s, s)
    whh_t = jax.random.uniform(ks[3], (HIDDEN, 4 * HIDDEN), jnp.float32, -s, s)
    b_ih = jax.random.uniform(ks[4], (4 * HIDDEN,), jnp.float32, -s, s)
    b_hh = jax.random.uniform(ks[5], (4 * HIDDEN,), jnp.float32, -s, s)
    lstm_b = (b_ih + b_hh).reshape(1, 4 * HIDDEN)

    # proj: Linear(EMBED, HIDDEN)  (xavier-normal-ish)
    projw_t = jax.random.normal(ks[6], (EMBED, HIDDEN), jnp.float32) * \
        jnp.sqrt(2.0 / (EMBED + HIDDEN))
    projb = jnp.zeros((1, HIDDEN), jnp.float32)

    # first_fc1: Linear(2H, 128); first_fc2: Linear(128, OUTPUT)  (kaiming-ish)
    fc1w_t = jax.random.normal(ks[7], (2 * HIDDEN, FC1), jnp.float32) * \
        jnp.sqrt(2.0 / (2 * HIDDEN))
    fc1b = jnp.zeros((1, FC1), jnp.float32)
    fc2w_t = jax.random.normal(ks[8], (FC1, OUTPUT), jnp.float32) * jnp.sqrt(2.0 / FC1)
    fc2w_pad = jnp.pad(fc2w_t, ((0, 0), (0, OUT_PAD - OUTPUT)))   # lane-dense head
    fc2b_pad = jnp.zeros((1, OUT_PAD), jnp.float32)

    h0 = jax.random.normal(ks[9], (BATCH, HIDDEN), jnp.float32)
    c0 = jax.random.normal(ks[10], (BATCH, HIDDEN), jnp.float32)

    # fold the embedding tables into the downstream projections (kernel does a
    # one-hot @ table matmul), and fold the 1/H attention-logit scale into proj.
    tokproj = jnp.pad(text_emb, ((0, VOCAB_PAD - VOCAB), (0, 0))) @ wih_t        # (Vp, 4H)
    goalproj_scaled = (jnp.pad(goal_emb, ((0, GOAL_PAD - GOAL_TYPES), (0, 0)))
                       @ projw_t) / float(HIDDEN)                                # (Gp, H)
    projb_scaled = projb / float(HIDDEN)

    # pack every constant operand into one lane-dense (SLAB_ROWS, 128) f32 slab
    def lane_pad(a):
        return jnp.pad(a, ((0, 0), (0, 128 - a.shape[1])))

    def row_pad(a, rows):
        return jnp.pad(a, ((0, rows - a.shape[0]), (0, 0)))

    slab = jnp.concatenate([
        tokproj,                               # [  0: 32)
        row_pad(lstm_b, 8),                    # [ 32: 40)
        whh_t,                                 # [ 40: 72)
        lane_pad(goalproj_scaled),             # [ 72: 80)
        row_pad(lane_pad(projb_scaled), 8),    # [ 80: 88)
        fc1w_t,                                # [ 88:152)
        row_pad(fc1b, 8),                      # [152:160)
        fc2w_pad,                              # [160:288)
        row_pad(fc2b_pad, 8),                  # [288:296)
        row_pad(lane_pad(h0), 8),              # [296:304)
        row_pad(lane_pad(c0), 8),              # [304:312)
    ], axis=0)
    assert slab.shape == (SLAB_ROWS, 128)
    return {"w_slab": slab}


# ----------------------------- forward (train) -------------------------------
@jax.jit
def rnn_forward(params, text, lengths, first_goal, final_goal):
    B, T = text.shape
    # No length sort: the kernel masks by length itself, so pack_padded_sequence's
    # sorted-order requirement is a PyTorch artifact with no numerical effect —
    # argsort / permute / inverse-permute are all dropped.
    ids = jnp.concatenate([
        text.T.reshape(T * B, 1),       # tokens, time-major (row = t*B + b)
        first_goal.reshape(B, 1),
        final_goal.reshape(B, 1),
    ], axis=0).astype(jnp.int32)
    out_pad = run_rnn_fused(lengths.astype(jnp.int32), ids, params["w_slab"])  # (B, OUT_PAD)
    return out_pad[:, :OUTPUT]


# --------------------------------- main ---------------------------------------
if __name__ == "__main__":
    key = jax.random.PRNGKey(0)
    pkey, dkey = jax.random.split(key)
    params = init_params(pkey)

    k1, k2, k3 = jax.random.split(dkey, 3)
    lengths = jnp.array([6, 8], dtype=jnp.int32)
    tokens = jax.random.randint(k1, (BATCH, SEQ), 1, VOCAB, dtype=jnp.int32)
    # pad positions beyond each sequence length with PAD_IDX
    pad_mask = jnp.arange(SEQ)[None, :] < lengths[:, None]
    text = jnp.where(pad_mask, tokens, PAD_IDX)
    first_goal = jax.random.randint(k2, (BATCH,), 0, GOAL_TYPES, dtype=jnp.int32)
    final_goal = jax.random.randint(k3, (BATCH,), 0, GOAL_TYPES, dtype=jnp.int32)

    out = rnn_forward(params, text, lengths, first_goal, final_goal)
    jax.block_until_ready(out)
    assert out.shape == (BATCH, OUTPUT)
    assert bool(jnp.all(jnp.isfinite(out)))
    print("KERNEL_OK")
</pallas_src>

<mosaic_0001>
module attributes {stable_mosaic.version = 11 : i64} {
  func.func @rnn_fused_kernel(%arg0: i32, %arg1: memref<2xi32, #tpu.memory_space<smem>>, %arg2: memref<20x1xi32, #tpu.memory_space<vmem>>, %arg3: memref<312x128xf32, #tpu.memory_space<vmem>>, %arg4: memref<2x128xf32, #tpu.memory_space<vmem>>) attributes {dimension_semantics = [#tpu.dimension_semantics<arbitrary>], iteration_bounds = array<i64: 1>, scalar_prefetch = 1 : i64, scratch_operands = 0 : i64, tpu.core_type = #tpu.core_type<tc>, window_params = [{pipeline_mode = #tpu.pipeline_mode<synchronous>, transform_indices = @transform_0, window_bounds = array<i64: 20, 1>}, {pipeline_mode = #tpu.pipeline_mode<synchronous>, transform_indices = @transform_1, window_bounds = array<i64: 312, 128>}, {pipeline_mode = #tpu.pipeline_mode<synchronous>, transform_indices = @transform_2, window_bounds = array<i64: 2, 128>}]} {
    %c0 = arith.constant 0 : index
    %c0_0 = arith.constant 0 : index
    %0 = vector.load %arg3[%c0, %c0_0] : memref<312x128xf32, #tpu.memory_space<vmem>>, vector<32x128xf32>
    %c32 = arith.constant 32 : index
    %c0_1 = arith.constant 0 : index
    %1 = vector.load %arg3[%c32, %c0_1] : memref<312x128xf32, #tpu.memory_space<vmem>>, vector<1x128xf32>
    %c40 = arith.constant 40 : index
    %c0_2 = arith.constant 0 : index
    %2 = vector.load %arg3[%c40, %c0_2] : memref<312x128xf32, #tpu.memory_space<vmem>>, vector<32x128xf32>
    %c72 = arith.constant 72 : index
    %c0_3 = arith.constant 0 : index
    %3 = vector.load %arg3[%c72, %c0_3] : memref<312x128xf32, #tpu.memory_space<vmem>>, vector<8x32xf32>
    %c80 = arith.constant 80 : index
    %c0_4 = arith.constant 0 : index
    %4 = vector.load %arg3[%c80, %c0_4] : memref<312x128xf32, #tpu.memory_space<vmem>>, vector<1x32xf32>
    %c88 = arith.constant 88 : index
    %c0_5 = arith.constant 0 : index
    %5 = vector.load %arg3[%c88, %c0_5] : memref<312x128xf32, #tpu.memory_space<vmem>>, vector<64x128xf32>
    %c152 = arith.constant 152 : index
    %c0_6 = arith.constant 0 : index
    %6 = vector.load %arg3[%c152, %c0_6] : memref<312x128xf32, #tpu.memory_space<vmem>>, vector<1x128xf32>
    %c160 = arith.constant 160 : index
    %c0_7 = arith.constant 0 : index
    %7 = vector.load %arg3[%c160, %c0_7] : memref<312x128xf32, #tpu.memory_space<vmem>>, vector<128x128xf32>
    %c288 = arith.constant 288 : index
    %c0_8 = arith.constant 0 : index
    %8 = vector.load %arg3[%c288, %c0_8] : memref<312x128xf32, #tpu.memory_space<vmem>>, vector<1x128xf32>
    %c296 = arith.constant 296 : index
    %c0_9 = arith.constant 0 : index
    %9 = vector.load %arg3[%c296, %c0_9] : memref<312x128xf32, #tpu.memory_space<vmem>>, vector<2x32xf32>
    %c304 = arith.constant 304 : index
    %c0_10 = arith.constant 0 : index
    %10 = vector.load %arg3[%c304, %c0_10] : memref<312x128xf32, #tpu.memory_space<vmem>>, vector<2x32xf32>
    %c0_11 = arith.constant 0 : index
    %c0_12 = arith.constant 0 : index
    %11 = vector.load %arg2[%c0_11, %c0_12] : memref<20x1xi32, #tpu.memory_space<vmem>>, vector<16x1xi32>
    %12 = tpu.iota {dimensions = array<i32: 1>} : vector<16x32xi32>
    %13 = vector.broadcast %11 : vector<16x1xi32> to vector<16x32xi32>
    %14 = arith.cmpi eq, %13, %12 : vector<16x32xi32>
    %15 = arith.extui %14 : vector<16x32xi1> to vector<16x32xi32>
    %16 = arith.sitofp %15 : vector<16x32xi32> to vector<16x32xf32>
    %cst = arith.constant dense<0.000000e+00> : vector<16x128xf32>
    %17 = tpu.matmul %16, %0, %cst {dimension_numbers = #tpu.dot_dimension_numbers<[1], [0], [0], [1], [0, 0, 1, 1], [], []>} : vector<16x32xf32>, vector<32x128xf32>, vector<16x128xf32> -> vector<16x128xf32>
    %18 = vector.broadcast %1 : vector<1x128xf32> to vector<16x128xf32>
    %19 = arith.addf %17, %18 : vector<16x128xf32>
    %c16 = arith.constant 16 : index
    %c0_13 = arith.constant 0 : index
    %20 = vector.load %arg2[%c16, %c0_13] : memref<20x1xi32, #tpu.memory_space<vmem>>, vector<4x1xi32>
    %21 = tpu.iota {dimensions = array<i32: 1>} : vector<4x8xi32>
    %22 = vector.broadcast %20 : vector<4x1xi32> to vector<4x8xi32>
    %23 = arith.cmpi eq, %22, %21 : vector<4x8xi32>
    %24 = arith.extui %23 : vector<4x8xi1> to vector<4x8xi32>
    %25 = arith.sitofp %24 : vector<4x8xi32> to vector<4x8xf32>
    %cst_14 = arith.constant dense<0.000000e+00> : vector<4x32xf32>
    %26 = tpu.matmul %25, %3, %cst_14 {dimension_numbers = #tpu.dot_dimension_numbers<[1], [0], [0], [1], [0, 0, 1, 1], [], []>} : vector<4x8xf32>, vector<8x32xf32>, vector<4x32xf32> -> vector<4x32xf32>
    %27 = vector.broadcast %4 : vector<1x32xf32> to vector<4x32xf32>
    %28 = arith.addf %26, %27 : vector<4x32xf32>
    %29 = arith.truncf %2 : vector<32x128xf32> to vector<32x128xbf16>
    %30 = vector.extract_strided_slice %19 {offsets = [0, 0], sizes = [2, 128], strides = [1, 1]} : vector<16x128xf32> to vector<2x128xf32>
    %31 = arith.truncf %9 : vector<2x32xf32> to vector<2x32xbf16>
    %cst_15 = arith.constant dense<0.000000e+00> : vector<2x128xf32>
    %32 = tpu.matmul %31, %29, %cst_15 {dimension_numbers = #tpu.dot_dimension_numbers<[1], [0], [0], [1], [0, 0, 1, 1], [], []>} : vector<2x32xbf16>, vector<32x128xbf16>, vector<2x128xf32> -> vector<2x128xf32>
    %33 = arith.addf %30, %32 : vector<2x128xf32>
    %34 = arith.negf %33 : vector<2x128xf32>
    %35 = math.exp %34 : vector<2x128xf32>
    %cst_16 = arith.constant 1.000000e+00 : f32
    %36 = vector.broadcast %cst_16 : f32 to vector<2x128xf32>
    %37 = arith.addf %36, %35 : vector<2x128xf32>
    %38 = arith.divf %36, %37 : vector<2x128xf32>
    %39 = vector.extract_strided_slice %38 {offsets = [0, 0], sizes = [2, 32], strides = [1, 1]} : vector<2x128xf32> to vector<2x32xf32>
    %40 = vector.extract_strided_slice %38 {offsets = [0, 32], sizes = [2, 32], strides = [1, 1]} : vector<2x128xf32> to vector<2x32xf32>
    %41 = vector.extract_strided_slice %38 {offsets = [0, 96], sizes = [2, 32], strides = [1, 1]} : vector<2x128xf32> to vector<2x32xf32>
    %42 = vector.extract_strided_slice %33 {offsets = [0, 64], sizes = [2, 32], strides = [1, 1]} : vector<2x128xf32> to vector<2x32xf32>
    %43 = math.tanh %42 : vector<2x32xf32>
    %44 = arith.mulf %40, %10 : vector<2x32xf32>
    %45 = arith.mulf %39, %43 : vector<2x32xf32>
    %46 = arith.addf %44, %45 : vector<2x32xf32>
    %47 = math.tanh %46 : vector<2x32xf32>
    %48 = arith.mulf %41, %47 : vector<2x32xf32>
    %49 = vector.extract_strided_slice %19 {offsets = [2, 0], sizes = [2, 128], strides = [1, 1]} : vector<16x128xf32> to vector<2x128xf32>
    %50 = arith.truncf %48 : vector<2x32xf32> to vector<2x32xbf16>
    %cst_17 = arith.constant dense<0.000000e+00> : vector<2x128xf32>
    %51 = tpu.matmul %50, %29, %cst_17 {dimension_numbers = #tpu.dot_dimension_numbers<[1], [0], [0], [1], [0, 0, 1, 1], [], []>} : vector<2x32xbf16>, vector<32x128xbf16>, vector<2x128xf32> -> vector<2x128xf32>
    %52 = arith.addf %49, %51 : vector<2x128xf32>
    %53 = arith.negf %52 : vector<2x128xf32>
    %54 = math.exp %53 : vector<2x128xf32>
    %cst_18 = arith.constant 1.000000e+00 : f32
    %55 = vector.broadcast %cst_18 : f32 to vector<2x128xf32>
    %56 = arith.addf %55, %54 : vector<2x128xf32>
    %57 = arith.divf %55, %56 : vector<2x128xf32>
    %58 = vector.extract_strided_slice %57 {offsets = [0, 0], sizes = [2, 32], strides = [1, 1]} : vector<2x128xf32> to vector<2x32xf32>
    %59 = vector.extract_strided_slice %57 {offsets = [0, 32], sizes = [2, 32], strides = [1, 1]} : vector<2x128xf32> to vector<2x32xf32>
    %60 = vector.extract_strided_slice %57 {offsets = [0, 96], sizes = [2, 32], strides = [1, 1]} : vector<2x128xf32> to vector<2x32xf32>
    %61 = vector.extract_strided_slice %52 {offsets = [0, 64], sizes = [2, 32], strides = [1, 1]} : vector<2x128xf32> to vector<2x32xf32>
    %62 = math.tanh %61 : vector<2x32xf32>
    %63 = arith.mulf %59, %46 : vector<2x32xf32>
    %64 = arith.mulf %58, %62 : vector<2x32xf32>
    %65 = arith.addf %63, %64 : vector<2x32xf32>
    %66 = math.tanh %65 : vector<2x32xf32>
    %67 = arith.mulf %60, %66 : vector<2x32xf32>
    %68 = vector.extract_strided_slice %19 {offsets = [4, 0], sizes = [2, 128], strides = [1, 1]} : vector<16x128xf32> to vector<2x128xf32>
    %69 = arith.truncf %67 : vector<2x32xf32> to vector<2x32xbf16>
    %cst_19 = arith.constant dense<0.000000e+00> : vector<2x128xf32>
    %70 = tpu.matmul %69, %29, %cst_19 {dimension_numbers = #tpu.dot_dimension_numbers<[1], [0], [0], [1], [0, 0, 1, 1], [], []>} : vector<2x32xbf16>, vector<32x128xbf16>, vector<2x128xf32> -> vector<2x128xf32>
    %71 = arith.addf %68, %70 : vector<2x128xf32>
    %72 = arith.negf %71 : vector<2x128xf32>
    %73 = math.exp %72 : vector<2x128xf32>
    %cst_20 = arith.constant 1.000000e+00 : f32
    %74 = vector.broadcast %cst_20 : f32 to vector<2x128xf32>
    %75 = arith.addf %74, %73 : vector<2x128xf32>
    %76 = arith.divf %74, %75 : vector<2x128xf32>
    %77 = vector.extract_strided_slice %76 {offsets = [0, 0], sizes = [2, 32], strides = [1, 1]} : vector<2x128xf32> to vector<2x32xf32>
    %78 = vector.extract_strided_slice %76 {offsets = [0, 32], sizes = [2, 32], strides = [1, 1]} : vector<2x128xf32> to vector<2x32xf32>
    %79 = vector.extract_strided_slice %76 {offsets = [0, 96], sizes = [2, 32], strides = [1, 1]} : vector<2x128xf32> to vector<2x32xf32>
    %80 = vector.extract_strided_slice %71 {offsets = [0, 64], sizes = [2, 32], strides = [1, 1]} : vector<2x128xf32> to vector<2x32xf32>
    %81 = math.tanh %80 : vector<2x32xf32>
    %82 = arith.mulf %78, %65 : vector<2x32xf32>
    %83 = arith.mulf %77, %81 : vector<2x32xf32>
    %84 = arith.addf %82, %83 : vector<2x32xf32>
    %85 = math.tanh %84 : vector<2x32xf32>
    %86 = arith.mulf %79, %85 : vector<2x32xf32>
    %87 = vector.extract_strided_slice %19 {offsets = [6, 0], sizes = [2, 128], strides = [1, 1]} : vector<16x128xf32> to vector<2x128xf32>
    %88 = arith.truncf %86 : vector<2x32xf32> to vector<2x32xbf16>
    %cst_21 = arith.constant dense<0.000000e+00> : vector<2x128xf32>
    %89 = tpu.matmul %88, %29, %cst_21 {dimension_numbers = #tpu.dot_dimension_numbers<[1], [0], [0], [1], [0, 0, 1, 1], [], []>} : vector<2x32xbf16>, vector<32x128xbf16>, vector<2x128xf32> -> vector<2x128xf32>
    %90 = arith.addf %87, %89 : vector<2x128xf32>
    %91 = arith.negf %90 : vector<2x128xf32>
    %92 = math.exp %91 : vector<2x128xf32>
    %cst_22 = arith.constant 1.000000e+00 : f32
    %93 = vector.broadcast %cst_22 : f32 to vector<2x128xf32>
    %94 = arith.addf %93, %92 : vector<2x128xf32>
    %95 = arith.divf %93, %94 : vector<2x128xf32>
    %96 = vector.extract_strided_slice %95 {offsets = [0, 0], sizes = [2, 32], strides = [1, 1]} : vector<2x128xf32> to vector<2x32xf32>
    %97 = vector.extract_strided_slice %95 {offsets = [0, 32], sizes = [2, 32], strides = [1, 1]} : vector<2x128xf32> to vector<2x32xf32>
    %98 = vector.extract_strided_slice %95 {offsets = [0, 96], sizes = [2, 32], strides = [1, 1]} : vector<2x128xf32> to vector<2x32xf32>
    %99 = vector.extract_strided_slice %90 {offsets = [0, 64], sizes = [2, 32], strides = [1, 1]} : vector<2x128xf32> to vector<2x32xf32>
    %100 = math.tanh %99 : vector<2x32xf32>
    %101 = arith.mulf %97, %84 : vector<2x32xf32>
    %102 = arith.mulf %96, %100 : vector<2x32xf32>
    %103 = arith.addf %101, %102 : vector<2x32xf32>
    %104 = math.tanh %103 : vector<2x32xf32>
    %105 = arith.mulf %98, %104 : vector<2x32xf32>
    %106 = vector.extract_strided_slice %19 {offsets = [8, 0], sizes = [2, 128], strides = [1, 1]} : vector<16x128xf32> to vector<2x128xf32>
    %107 = arith.truncf %105 : vector<2x32xf32> to vector<2x32xbf16>
    %cst_23 = arith.constant dense<0.000000e+00> : vector<2x128xf32>
    %108 = tpu.matmul %107, %29, %cst_23 {dimension_numbers = #tpu.dot_dimension_numbers<[1], [0], [0], [1], [0, 0, 1, 1], [], []>} : vector<2x32xbf16>, vector<32x128xbf16>, vector<2x128xf32> -> vector<2x128xf32>
    %109 = arith.addf %106, %108 : vector<2x128xf32>
    %110 = arith.negf %109 : vector<2x128xf32>
    %111 = math.exp %110 : vector<2x128xf32>
    %cst_24 = arith.constant 1.000000e+00 : f32
    %112 = vector.broadcast %cst_24 : f32 to vector<2x128xf32>
    %113 = arith.addf %112, %111 : vector<2x128xf32>
    %114 = arith.divf %112, %113 : vector<2x128xf32>
    %115 = vector.extract_strided_slice %114 {offsets = [0, 0], sizes = [2, 32], strides = [1, 1]} : vector<2x128xf32> to vector<2x32xf32>
    %116 = vector.extract_strided_slice %114 {offsets = [0, 32], sizes = [2, 32], strides = [1, 1]} : vector<2x128xf32> to vector<2x32xf32>
    %117 = vector.extract_strided_slice %114 {offsets = [0, 96], sizes = [2, 32], strides = [1, 1]} : vector<2x128xf32> to vector<2x32xf32>
    %118 = vector.extract_strided_slice %109 {offsets = [0, 64], sizes = [2, 32], strides = [1, 1]} : vector<2x128xf32> to vector<2x32xf32>
    %119 = math.tanh %118 : vector<2x32xf32>
    %120 = arith.mulf %116, %103 : vector<2x32xf32>
    %121 = arith.mulf %115, %119 : vector<2x32xf32>
    %122 = arith.addf %120, %121 : vector<2x32xf32>
    %123 = math.tanh %122 : vector<2x32xf32>
    %124 = arith.mulf %117, %123 : vector<2x32xf32>
    %125 = vector.extract_strided_slice %19 {offsets = [10, 0], sizes = [2, 128], strides = [1, 1]} : vector<16x128xf32> to vector<2x128xf32>
    %126 = arith.truncf %124 : vector<2x32xf32> to vector<2x32xbf16>
    %cst_25 = arith.constant dense<0.000000e+00> : vector<2x128xf32>
    %127 = tpu.matmul %126, %29, %cst_25 {dimension_numbers = #tpu.dot_dimension_numbers<[1], [0], [0], [1], [0, 0, 1, 1], [], []>} : vector<2x32xbf16>, vector<32x128xbf16>, vector<2x128xf32> -> vector<2x128xf32>
    %128 = arith.addf %125, %127 : vector<2x128xf32>
    %129 = arith.negf %128 : vector<2x128xf32>
    %130 = math.exp %129 : vector<2x128xf32>
    %cst_26 = arith.constant 1.000000e+00 : f32
    %131 = vector.broadcast %cst_26 : f32 to vector<2x128xf32>
    %132 = arith.addf %131, %130 : vector<2x128xf32>
    %133 = arith.divf %131, %132 : vector<2x128xf32>
    %134 = vector.extract_strided_slice %133 {offsets = [0, 0], sizes = [2, 32], strides = [1, 1]} : vector<2x128xf32> to vector<2x32xf32>
    %135 = vector.extract_strided_slice %133 {offsets = [0, 32], sizes = [2, 32], strides = [1, 1]} : vector<2x128xf32> to vector<2x32xf32>
    %136 = vector.extract_strided_slice %133 {offsets = [0, 96], sizes = [2, 32], strides = [1, 1]} : vector<2x128xf32> to vector<2x32xf32>
    %137 = vector.extract_strided_slice %128 {offsets = [0, 64], sizes = [2, 32], strides = [1, 1]} : vector<2x128xf32> to vector<2x32xf32>
    %138 = math.tanh %137 : vector<2x32xf32>
    %139 = arith.mulf %135, %122 : vector<2x32xf32>
    %140 = arith.mulf %134, %138 : vector<2x32xf32>
    %141 = arith.addf %139, %140 : vector<2x32xf32>
    %142 = math.tanh %141 : vector<2x32xf32>
    %143 = arith.mulf %136, %142 : vector<2x32xf32>
    %144 = vector.extract_strided_slice %19 {offsets = [12, 0], sizes = [2, 128], strides = [1, 1]} : vector<16x128xf32> to vector<2x128xf32>
    %145 = arith.truncf %143 : vector<2x32xf32> to vector<2x32xbf16>
    %cst_27 = arith.constant dense<0.000000e+00> : vector<2x128xf32>
    %146 = tpu.matmul %145, %29, %cst_27 {dimension_numbers = #tpu.dot_dimension_numbers<[1], [0], [0], [1], [0, 0, 1, 1], [], []>} : vector<2x32xbf16>, vector<32x128xbf16>, vector<2x128xf32> -> vector<2x128xf32>
    %147 = arith.addf %144, %146 : vector<2x128xf32>
    %148 = arith.negf %147 : vector<2x128xf32>
    %149 = math.exp %148 : vector<2x128xf32>
    %cst_28 = arith.constant 1.000000e+00 : f32
    %150 = vector.broadcast %cst_28 : f32 to vector<2x128xf32>
    %151 = arith.addf %150, %149 : vector<2x128xf32>
    %152 = arith.divf %150, %151 : vector<2x128xf32>
    %153 = vector.extract_strided_slice %152 {offsets = [0, 0], sizes = [2, 32], strides = [1, 1]} : vector<2x128xf32> to vector<2x32xf32>
    %154 = vector.extract_strided_slice %152 {offsets = [0, 32], sizes = [2, 32], strides = [1, 1]} : vector<2x128xf32> to vector<2x32xf32>
    %155 = vector.extract_strided_slice %152 {offsets = [0, 96], sizes = [2, 32], strides = [1, 1]} : vector<2x128xf32> to vector<2x32xf32>
    %156 = vector.extract_strided_slice %147 {offsets = [0, 64], sizes = [2, 32], strides = [1, 1]} : vector<2x128xf32> to vector<2x32xf32>
    %157 = math.tanh %156 : vector<2x32xf32>
    %158 = arith.mulf %154, %141 : vector<2x32xf32>
    %159 = arith.mulf %153, %157 : vector<2x32xf32>
    %160 = arith.addf %158, %159 : vector<2x32xf32>
    %161 = math.tanh %160 : vector<2x32xf32>
    %162 = arith.mulf %155, %161 : vector<2x32xf32>
    %163 = vector.extract_strided_slice %19 {offsets = [14, 0], sizes = [2, 128], strides = [1, 1]} : vector<16x128xf32> to vector<2x128xf32>
    %164 = arith.truncf %162 : vector<2x32xf32> to vector<2x32xbf16>
    %cst_29 = arith.constant dense<0.000000e+00> : vector<2x128xf32>
    %165 = tpu.matmul %164, %29, %cst_29 {dimension_numbers = #tpu.dot_dimension_numbers<[1], [0], [0], [1], [0, 0, 1, 1], [], []>} : vector<2x32xbf16>, vector<32x128xbf16>, vector<2x128xf32> -> vector<2x128xf32>
    %166 = arith.addf %163, %165 : vector<2x128xf32>
    %167 = arith.negf %166 : vector<2x128xf32>
    %168 = math.exp %167 : vector<2x128xf32>
    %cst_30 = arith.constant 1.000000e+00 : f32
    %169 = vector.broadcast %cst_30 : f32 to vector<2x128xf32>
    %170 = arith.addf %169, %168 : vector<2x128xf32>
    %171 = arith.divf %169, %170 : vector<2x128xf32>
    %172 = vector.extract_strided_slice %171 {offsets = [0, 0], sizes = [2, 32], strides = [1, 1]} : vector<2x128xf32> to vector<2x32xf32>
    %173 = vector.extract_strided_slice %171 {offsets = [0, 32], sizes = [2, 32], strides = [1, 1]} : vector<2x128xf32> to vector<2x32xf32>
    %174 = vector.extract_strided_slice %171 {offsets = [0, 96], sizes = [2, 32], strides = [1, 1]} : vector<2x128xf32> to vector<2x32xf32>
    %175 = vector.extract_strided_slice %166 {offsets = [0, 64], sizes = [2, 32], strides = [1, 1]} : vector<2x128xf32> to vector<2x32xf32>
    %176 = math.tanh %175 : vector<2x32xf32>
    %177 = arith.mulf %173, %160 : vector<2x32xf32>
    %178 = arith.mulf %172, %176 : vector<2x32xf32>
    %179 = arith.addf %177, %178 : vector<2x32xf32>
    %180 = math.tanh %179 : vector<2x32xf32>
    %181 = arith.mulf %174, %180 : vector<2x32xf32>
    %182 = tpu.concatenate %48, %67, %86, %105, %124, %143, %162, %181 in 0 : vector<2x32xf32>, vector<2x32xf32>, vector<2x32xf32>, vector<2x32xf32>, vector<2x32xf32>, vector<2x32xf32>, vector<2x32xf32>, vector<2x32xf32> -> vector<16x32xf32>
    %183 = tpu.iota {dimensions = array<i32: 0>} : vector<16x1xi32>
    %c1_i32 = arith.constant 1 : i32
    %184 = vector.broadcast %c1_i32 : i32 to vector<16x1xi32>
    %185 = arith.shrsi %183, %184 : vector<16x1xi32>
    %c1_i32_31 = arith.constant 1 : i32
    %186 = vector.broadcast %c1_i32_31 : i32 to vector<16x1xi32>
    %187 = arith.andi %183, %186 : vector<16x1xi32>
    %c0_i32 = arith.constant 0 : i32
    %188 = vector.broadcast %c0_i32 : i32 to vector<16x1xi32>
    %c0_i32_32 = arith.constant 0 : i32
    %189 = vector.broadcast %c0_i32_32 : i32 to vector<16x1xi32>
    %190 = arith.cmpi eq, %187, %189 : vector<16x1xi32>
    %c0_33 = arith.constant 0 : index
    %191 = memref.load %arg1[%c0_33] : memref<2xi32, #tpu.memory_space<smem>>
    %192 = vector.broadcast %191 : i32 to vector<16x1xi32>
    %193 = arith.select %190, %192, %188 : vector<16x1xi1>, vector<16x1xi32>
    %c1_i32_34 = arith.constant 1 : i32
    %194 = vector.broadcast %c1_i32_34 : i32 to vector<16x1xi32>
    %195 = arith.cmpi eq, %187, %194 : vector<16x1xi32>
    %c1 = arith.constant 1 : index
    %196 = memref.load %arg1[%c1] : memref<2xi32, #tpu.memory_space<smem>>
    %197 = vector.broadcast %196 : i32 to vector<16x1xi32>
    %198 = arith.select %195, %197, %193 : vector<16x1xi1>, vector<16x1xi32>
    %199 = arith.cmpi slt, %185, %198 : vector<16x1xi32>
    %200 = arith.extui %199 : vector<16x1xi1> to vector<16x1xi32>
    %201 = arith.sitofp %200 : vector<16x1xi32> to vector<16x1xf32>
    %202 = vector.broadcast %201 : vector<16x1xf32> to vector<16x32xf32>
    %203 = arith.mulf %182, %202 : vector<16x32xf32>
    %cst_35 = arith.constant dense<0.000000e+00> : vector<4x16xf32>
    %204 = tpu.matmul %28, %203, %cst_35 {dimension_numbers = #tpu.dot_dimension_numbers<[1], [1], [0], [0], [0, 0, 1, 0], [], []>} : vector<4x32xf32>, vector<16x32xf32>, vector<4x16xf32> -> vector<4x16xf32>
    %205 = tpu.iota {dimensions = array<i32: 1>} : vector<4x16xi32>
    %c1_i32_36 = arith.constant 1 : i32
    %206 = vector.broadcast %c1_i32_36 : i32 to vector<4x16xi32>
    %207 = arith.shrsi %205, %206 : vector<4x16xi32>
    %c1_i32_37 = arith.constant 1 : i32
    %208 = vector.broadcast %c1_i32_37 : i32 to vector<4x16xi32>
    %209 = arith.andi %205, %208 : vector<4x16xi32>
    %210 = tpu.iota {dimensions = array<i32: 0>} : vector<4x16xi32>
    %c1_i32_38 = arith.constant 1 : i32
    %211 = vector.broadcast %c1_i32_38 : i32 to vector<4x16xi32>
    %212 = arith.andi %210, %211 : vector<4x16xi32>
    %c0_i32_39 = arith.constant 0 : i32
    %213 = vector.broadcast %c0_i32_39 : i32 to vector<4x16xi32>
    %c0_i32_40 = arith.constant 0 : i32
    %214 = vector.broadcast %c0_i32_40 : i32 to vector<4x16xi32>
    %215 = arith.cmpi eq, %209, %214 : vector<4x16xi32>
    %c0_41 = arith.constant 0 : index
    %216 = memref.load %arg1[%c0_41] : memref<2xi32, #tpu.memory_space<smem>>
    %217 = vector.broadcast %216 : i32 to vector<4x16xi32>
    %218 = arith.select %215, %217, %213 : vector<4x16xi1>, vector<4x16xi32>
    %c1_i32_42 = arith.constant 1 : i32
    %219 = vector.broadcast %c1_i32_42 : i32 to vector<4x16xi32>
    %220 = arith.cmpi eq, %209, %219 : vector<4x16xi32>
    %c1_43 = arith.constant 1 : index
    %221 = memref.load %arg1[%c1_43] : memref<2xi32, #tpu.memory_space<smem>>
    %222 = vector.broadcast %221 : i32 to vector<4x16xi32>
    %223 = arith.select %220, %222, %218 : vector<4x16xi1>, vector<4x16xi32>
    %224 = arith.cmpi ne, %209, %212 : vector<4x16xi32>
    %225 = arith.cmpi sge, %207, %223 : vector<4x16xi32>
    %226 = arith.ori %224, %225 : vector<4x16xi1>
    %cst_44 = arith.constant -1.000000e+09 : f32
    %cst_45 = arith.constant 0.000000e+00 : f32
    %227 = vector.broadcast %cst_44 : f32 to vector<4x16xf32>
    %228 = vector.broadcast %cst_45 : f32 to vector<4x16xf32>
    %229 = arith.select %226, %227, %228 : vector<4x16xi1>, vector<4x16xf32>
    %230 = arith.addf %204, %229 : vector<4x16xf32>
    %cst_46 = arith.constant dense<0xFF800000> : vector<4xf32>
    %231 = vector.multi_reduction <maximumf>, %230, %cst_46 [1] : vector<4x16xf32> to vector<4xf32>
    %232 = vector.shape_cast %231 : vector<4xf32> to vector<4x1xf32>
    %233 = vector.broadcast %232 : vector<4x1xf32> to vector<4x16xf32>
    %234 = arith.subf %230, %233 : vector<4x16xf32>
    %235 = math.exp %234 : vector<4x16xf32>
    %cst_47 = arith.constant dense<0.000000e+00> : vector<4xf32>
    %236 = vector.multi_reduction <add>, %235, %cst_47 [1] : vector<4x16xf32> to vector<4xf32>
    %237 = vector.shape_cast %236 : vector<4xf32> to vector<4x1xf32>
    %238 = tpu.reciprocal %237 {approx = true} : vector<4x1xf32> -> vector<4x1xf32>
    %239 = vector.broadcast %238 : vector<4x1xf32> to vector<4x16xf32>
    %240 = arith.mulf %235, %239 : vector<4x16xf32>
    %cst_48 = arith.constant dense<0.000000e+00> : vector<4x32xf32>
    %241 = tpu.matmul %240, %203, %cst_48 {dimension_numbers = #tpu.dot_dimension_numbers<[1], [0], [0], [1], [0, 0, 1, 1], [], []>} : vector<4x16xf32>, vector<16x32xf32>, vector<4x32xf32> -> vector<4x32xf32>
    %242 = vector.extract_strided_slice %241 {offsets = [0, 0], sizes = [2, 32], strides = [1, 1]} : vector<4x32xf32> to vector<2x32xf32>
    %243 = vector.extract_strided_slice %5 {offsets = [0, 0], sizes = [32, 128], strides = [1, 1]} : vector<64x128xf32> to vector<32x128xf32>
    %cst_49 = arith.constant dense<0.000000e+00> : vector<2x128xf32>
    %244 = tpu.matmul %242, %243, %cst_49 {dimension_numbers = #tpu.dot_dimension_numbers<[1], [0], [0], [1], [0, 0, 1, 1], [], []>} : vector<2x32xf32>, vector<32x128xf32>, vector<2x128xf32> -> vector<2x128xf32>
    %245 = vector.extract_strided_slice %241 {offsets = [2, 0], sizes = [2, 32], strides = [1, 1]} : vector<4x32xf32> to vector<2x32xf32>
    %246 = vector.extract_strided_slice %5 {offsets = [32, 0], sizes = [32, 128], strides = [1, 1]} : vector<64x128xf32> to vector<32x128xf32>
    %cst_50 = arith.constant dense<0.000000e+00> : vector<2x128xf32>
    %247 = tpu.matmul %245, %246, %cst_50 {dimension_numbers = #tpu.dot_dimension_numbers<[1], [0], [0], [1], [0, 0, 1, 1], [], []>} : vector<2x32xf32>, vector<32x128xf32>, vector<2x128xf32> -> vector<2x128xf32>
    %248 = arith.addf %244, %247 : vector<2x128xf32>
    %249 = vector.broadcast %6 : vector<1x128xf32> to vector<2x128xf32>
    %250 = arith.addf %248, %249 : vector<2x128xf32>
    %cst_51 = arith.constant 0.000000e+00 : f32
    %251 = vector.broadcast %cst_51 : f32 to vector<2x128xf32>
    %252 = arith.maximumf %250, %251 : vector<2x128xf32>
    %cst_52 = arith.constant dense<0.000000e+00> : vector<2x128xf32>
    %253 = tpu.matmul %252, %7, %cst_52 {dimension_numbers = #tpu.dot_dimension_numbers<[1], [0], [0], [1], [0, 0, 1, 1], [], []>} : vector<2x128xf32>, vector<128x128xf32>, vector<2x128xf32> -> vector<2x128xf32>
    %254 = vector.broadcast %8 : vector<1x128xf32> to vector<2x128xf32>
    %255 = arith.addf %253, %254 : vector<2x128xf32>
    %c0_53 = arith.constant 0 : index
    %c0_54 = arith.constant 0 : index
    %256 = vector.load %arg4[%c0_53, %c0_54] : memref<2x128xf32, #tpu.memory_space<vmem>>, vector<2x128xf32>
    tpu.vector_store %arg4[%c0_53, %c0_54], %255 {strides = array<i32>} : memref<2x128xf32, #tpu.memory_space<vmem>>, vector<2x128xf32>,
    return
  }
  func.func @transform_0(%arg0: i32, %arg1: memref<2xi32, #tpu.memory_space<smem>>) -> (i32, i32) {
    %c0_i32 = arith.constant 0 : i32
    %c0_i32_0 = arith.constant 0 : i32
    %c0_i32_1 = arith.constant 0 : i32
    return %c0_i32, %c0_i32_0 : i32, i32
  }
  func.func @transform_1(%arg0: i32, %arg1: memref<2xi32, #tpu.memory_space<smem>>) -> (i32, i32) {
    %c0_i32 = arith.constant 0 : i32
    %c0_i32_0 = arith.constant 0 : i32
    %c0_i32_1 = arith.constant 0 : i32
    return %c0_i32, %c0_i32_0 : i32, i32
  }
  func.func @transform_2(%arg0: i32, %arg1: memref<2xi32, #tpu.memory_space<smem>>) -> (i32, i32) {
    %c0_i32 = arith.constant 0 : i32
    %c0_i32_0 = arith.constant 0 : i32
    %c0_i32_1 = arith.constant 0 : i32
    return %c0_i32, %c0_i32_0 : i32, i32
  }
}

</mosaic_0001>

<bundles_post_ra>
// kernel: rnn_forward.1
= control target key start
LH: loop header
LB: loop body
LE: loop exit
PB: predicated region body
PF: predicated region fallthrough
CT: control target
= control target key end

     0   :  { %s1970_s0 = inlined_call_operand.vmem [shape: s32[2], index: 0, kind: input, shape index: {}]   ;;  %s1971_s1 = inlined_call_operand.vmem [shape: s32[20,1], index: 1, kind: input, shape index: {}]   ;;  %s1972_s2 = inlined_call_operand.hbm [shape: f32[312,128], index: 2, kind: input, shape index: {}]   ;;  %s1973_s3 = inlined_call_operand.hbm [shape: f32[2,128], index: 3, kind: output, shape index: {}]  }
   0x1   :  { %s8_s14 = sshll.u32 %s1970_s0, 4  ;;  %s9_s14 = int_to_ptr.vmem [resolvable:$true] %s8_s14 }
   0x2   :  { %s1673_s15 = scalar_lea.vmem %s9_s14, 16  ;;  %p1678_p1 = scmp.lt.s32.totalorder %s9_s14, %s9_s14 }
   0x3   :  { %p1674_p0 = scmp.ne.s32.totalorder %s9_s14, %s1673_s15  ;;  %p1679_p2 = scmp.lt.s32.totalorder %s1673_s15, %s1673_s15 }
   0x5   :  { %p1680_p3 = por %p1679_p2, %p1678_p1 }
   0x7   :  { %p1681_p4 = pnand %p1680_p3, %p1674_p0 }
   0x9   :  { %1684 = shalt.err (!%p1681_p4)  }
   0xa   :  { %s1731_s16 = smov [#allocation3]  }
   0xb   :  { %11 = dma.vmem_to_smem %s9_s14, 16, %s1731_s16, [#allocation2] }
   0xc   :  { %1725 = dma.done.wait [#allocation2], 16 }
   0xd   :  { %1726 = vsyncadd [#allocation2], 4294967280 }
   0xe   :  { %13 = sfence }
   0xf   :  { %14 = vsyncpa [#allocation5], 0 }
  0x10   :  { %15 = vsyncpa [#allocation6], 0  ;;  %s1732_s17 = smov [#allocation4]  }
  0x11   :  { %s23_s18 = sshll.u32 %s1732_s17, 4  ;;  %s24_s18 = int_to_ptr.vmem [resolvable:$true] %s23_s18 }
  0x12   :  { %s1693_s19 = scalar_lea.vmem %s24_s18, 4992  ;;  %p1698_p6 = scmp.lt.s32.totalorder %s24_s18, %s24_s18 }
  0x13   :  { %p1694_p5 = scmp.ne.s32.totalorder %s24_s18, %s1693_s19  ;;  %p1699_p7 = scmp.lt.s32.totalorder %s1693_s19, %s1693_s19 }
  0x15   :  { %p1700_p8 = por %p1699_p7, %p1698_p6 }
  0x17   :  { %p1701_p9 = pnand %p1700_p8, %p1694_p5 }
  0x19   :  { %1704 = shalt.err (!%p1701_p9)
}
  0x1a   :  { %s1733_s0 = smov 128   ;;  %s1734_s20 = smov 8  }
  0x1b   :  { %29 = dma.hbm_to_vmem [thread:$0]  %s1972_s2, 4992, %s24_s18, [#allocation5], %s1733_s0, %s1733_s0, %s1734_s20  }
  0x1c   :  { %1727 = dma.done.wait [#allocation5], 4992  }
  0x1d   :  { %1728 = vsyncadd [#allocation5], 4294962304  ;;  %v1735_v0 = vmov 0   ;;  %v1736_v1 = vmov 0.0   ;;  %v73_v2 = vld [vmem:[%s1971_s1] sm:$0xff]  ;;  %v37_v4 = vld [vmem:[#allocation4 + $0x18] sm:$0xff]  ;;  %v75_v16 = vlaneseq }
  0x1e   :  { %1603 = vset.pattern.permute.xlu0 %v1735_v0  ;;  %1604 = vset.pattern.permute.xlu1 %v1735_v0  ;;  %v175_v3 = vld [vmem:[%s1971_s1 + $0x10] sm:$0xf]  ;;  %v74_v6 = vld [vmem:[%s1971_s1 + $0x8] sm:$0xff]  ;;  %v41_v8 = vld [vmem:[#allocation4 + $0x38] sm:$0xff]  ;;  %vm1737_vm0 = vmmov 0   ;;  %s1738_s1 = smov 32  }
  0x1f   :  { %1466 = vmatprep.subr.bf16.mxu0 %v1736_v1  ;;  %78 = vperm.xlu0 %1603, %v73_v2   ;;  %v36_v5 = vld [vmem:[#allocation4 + $0x10] sm:$0xff]  ;;  %v35_v7 = vld [vmem:[#allocation4 + $0x8] sm:$0xff]  ;;  %v42_v9 = vld [vmem:[#allocation4 + $0x40] sm:$0xff]  ;;  %v1790_v17 = vand.u32 127, %v75_v16  ;;  %vm93_vm1 = vcmask 261120   ;;  %vm186_vm5 = vcmask 64512  }
  0x20   :  { %177 = vperm.xlu1 %1604, %v175_v3   ;;  %1442 = vmatprep.subr.mxu1 %v37_v4  ;;  %v34_v10 = vld [vmem:[#allocation4] sm:$0xff]  ;;  %v1777_v11 = vpack.c.bf16 %v42_v9, %v41_v8  ;;  %v39_v12 = vld [vmem:[#allocation4 + $0x28] sm:$0xff]  ;;  %v40_v13 = vld [vmem:[#allocation4 + $0x30] sm:$0xff]  ;;  %s1739_s28 = smov 64   ;;  %vm883_vm6 = vcmask 1041408   ;;  %vm885_vm7 = vcmask 1043456  }
  0x21   :  { %1443 = vmatpush3.msra.mxu1 %v37_v4  ;;  %1470 = vmatprep.mubr.msk.bf16.mxu0 %vm1737_vm0, %v1736_v1  ;;  %v1784_v14 = vpack.c.bf16 %v40_v13, %v39_v12  ;;  %v72_v15 = vld [vmem:[#allocation4 + $0x130] sm:$0x3]  ;;  %v43_v22 = vld [vmem:[#allocation4 + $0x48] sm:$0xff]  ;;  %v1344_v27 = vld [vmem:[#allocation4 + $0x20] ss:$0 sm:$0xff]  ;;  %vm887_vm8 = vcmask 1045504  }
  0x22   :  { %1444 = vmatprep.subr.mxu1 %v36_v5  ;;  %1467 = vmatpush3.bf16.msra.mxu0 %v1777_v11  ;;  %v71_v25 = vld [vmem:[#allocation4 + $0x128] sm:$0x3]  ;;  %s901_s29 = sld [smem:[#allocation3]]  ;;  %s1740_s4 = smov [#allocation7]  }
  0x23   :  { %81 = vperm.xlu0 %1603, %v74_v6   ;;  %1445 = vmatpush3.msra.mxu1 %v36_v5  ;;  %v262_v26 = vpack.c.bf16 %v71_v25, %v71_v25  ;;  %s1366_s30 = sld [smem:[#allocation3 + $0x1]]  ;;  %s1333_s5 = sshll.u32 %s1740_s4, 4  ;;  %s1334_s5 = int_to_ptr.vmem [resolvable:$true] %s1333_s5 }
  0x24   :  { %1446 = vmatprep.subr.mxu1 %v35_v7  ;;  %1468 = vmatprep.subr.bf16.mxu0 %v1736_v1  ;;  %s1705_s6 = scalar_lea.vmem %s1334_s5, 32  ;;  %p1710_p11 = scmp.lt.s32.totalorder %s1334_s5, %s1334_s5 }
  0x25   :  { %1447 = vmatpush3.msra.mxu1 %v35_v7  ;;  %p1706_p10 = scmp.ne.s32.totalorder %s1334_s5, %s1705_s6  ;;  %p1711_p12 = scmp.lt.s32.totalorder %s1705_s6, %s1705_s6 }
  0x26   :  { %1448 = vmatprep.subr.mxu1 %v34_v10  ;;  %1469 = vmatpush3.bf16.msra.mxu0 %v1784_v14 }
  0x27   :  { %1449 = vmatpush3.msra.mxu1 %v34_v10  ;;  %1482 = vmatprep.subr.bf16.mxu0 %v1736_v1  ;;  %p1712_p13 = por %p1711_p12, %p1710_p11 }
  0x28   :  { %1453 = vmatprep.subr.mxu1 %v1736_v1  ;;  %315 = vrot.lane.b32.xlu0 %v72_v15, %s1738_s1 }
  0x29   :  { %p1713_p0 = pnand %p1712_p13, %p1706_p10 }
  0x9a   :  { %v79_v18 = vpop.permute.xlu0 %78 }
  0x9b   :  { %vm83_vm2 = vcmp.eq.s32.totalorder %v79_v18, %v1790_v17  ;;  %v178_v20 = vpop.permute.xlu1 %177 }
  0x9c   :  { %v1342_v19 = vsel %vm83_vm2, 1.0, %v1736_v1  ;;  %vm179_vm4 = vcmp.eq.s32.totalorder %v178_v20, %v1790_v17 }
  0x9d   :  { %1450 = vmatprep.mubr.msk.f32.mxu1 %vm93_vm1, %v1342_v19  ;;  %v1347_v24 = vsel %vm179_vm4, 1.0, %v1736_v1 }
  0x9e   :  { %v82_v21 = vpop.permute.xlu0 %81 }
  0x9f   :  { %vm84_vm3 = vcmp.eq.s32.totalorder %v82_v21, %v1790_v17 }
  0xa0   :  { %v1343_v23 = vsel %vm84_vm3, 1.0, %v1736_v1 }
  0xa1   :  { %1451 = vmatmul.mubr.msk.f32.vlgmr.msra.gmra.mxu1 %vm93_vm1, %v1343_v23 }
  0xa2   :  { %1454 = vmatpush3.msra.mxu1 %v43_v22  ;;  %1455 = vmatprep.mubr.msk.f32.mxu1 %vm1737_vm0, %v1736_v1  ;;  %v316_v46 = vpop.permute.xlu0 %315 }
  0xa3   :  { %1458 = vmatprep.subr.bf16.mxu1 %v1736_v1 }
  0xa5   :  { %1456 = vmatmul.mubr.msk.f32.vlgmr.msra.gmra.mxu1 %vm186_vm5, %v1347_v24 }
  0xa6   :  { %1459 = vmatpush3.bf16.msra.mxu1 %v1777_v11  ;;  %1462 = vmatprep.mubr.msk.bf16.mxu1 %vm1737_vm0, %v1736_v1 }
  0xa7   :  { %1460 = vmatprep.subr.bf16.mxu1 %v1736_v1 }
  0xaa   :  { %1461 = vmatpush3.bf16.msra.mxu1 %v1784_v14 }
  0xab   :  { %1474 = vmatprep.subr.bf16.mxu1 %v1736_v1 }
  0xad   :  { %1463 = vmatmul.mubr.msk.bf16.vlgmr.msra.gmra.mxu1 %vm93_vm1, %v262_v26 }
  0xae   :  { %1475 = vmatpush3.bf16.msra.mxu1 %v1777_v11  ;;  %1478 = vmatprep.mubr.msk.bf16.mxu1 %vm1737_vm0, %v1736_v1 }
  0xaf   :  { %1476 = vmatprep.subr.bf16.mxu1 %v1736_v1 }
  0xb2   :  { %1477 = vmatpush3.bf16.msra.mxu1 %v1784_v14 }
  0xb3   :  { %1490 = vmatprep.subr.bf16.mxu1 %v1736_v1 }
 0x161   :  { %v1452_v28 = vpop.f32.mrf.mxu1 }
 0x162   :  { %v1816_v29 = vadd.f32 %v1452_v28, %v1344_v27 }
 0x163   :  { %v166_v30 = vpop.f32.mrf.mxu1 }
 0x164   :  { %v1820_v33 = vadd.f32 %v1344_v27, %v166_v30 }
 0x165   :  { %v1818_v31 = vpop.f32.mrf.mxu1 }
 0x167   :  { %v1457_v32 = vpop.f32.mrf.mxu1 }
 0x16d   :  { %v300_v34 = vpop.f32.mrf.mxu1 }
 0x16e   :  { %v306_v35 = vadd.f32 %v300_v34, %v1820_v33 }
 0x16f   :  { %v1464_v36 = vpop.f32.mrf.mxu1 }
 0x170   :  { %1605 = vtanh.f32 %v306_v35  ;;  %v1351_v40 = vmul.f32 -1.442695, %v306_v35 }
 0x171   :  { %v303_v37 = vpop.f32.mrf.mxu1 }
 0x172   :  { %1607 = vpow2.f32 %v1351_v40 }
 0x173   :  { %v1465_v38 = vpop.f32.mrf.mxu1 }
 0x17d   :  { %v1606_v39 = vpop.eup %1605 }
 0x17e   :  { %320 = vrot.lane.b32.xlu1 %v1606_v39, %s1739_s28 }
 0x17f   :  { %v1608_v41 = vpop.eup %1607 }
 0x180   :  { %v310_v42 = vadd.f32 1.0, %v1608_v41 }
 0x182   :  { %1609 = vrcp.f32 %v310_v42 }
 0x18f   :  { %v1610_v43 = vpop.eup %1609 }
 0x190   :  { %v318_v47 = vmul.f32 %v1610_v43, %v316_v46 }
 0x1f0   :  { %v321_v44 = vpop.permute.xlu1 %320 }
 0x1f1   :  { %v323_v45 = vmul.f32 %v1610_v43, %v321_v44 }
 0x1f3   :  { %325 = vrot.lane.b32.xlu1 %v323_v45, %s1738_s1 }
 0x265   :  { %v326_v48 = vpop.permute.xlu1 %325 }
 0x266   :  { %v328_v49 = vadd.f32 %v326_v48, %v318_v47 }
 0x268   :  { %1611 = vtanh.f32 %v328_v49  ;;  %v394_v5 = vrot.slane %v328_v49, 6 }
 0x275   :  { %v1612_v50 = vpop.eup %1611 }
 0x276   :  { %331 = vrot.lane.b32.xlu0 %v1612_v50, %s1739_s28 }
 0x2e8   :  { %v332_v51 = vpop.permute.xlu0 %331 }
 0x2e9   :  { %v1826_v52 = vmul.f32 %v1610_v43, %v332_v51 }
 0x2eb   :  { %v335_v53 = vpack.c.bf16 %v1826_v52, %v1826_v52 }
 0x2ed   :  { %337 = vrot.lane.b32.xlu1 %v335_v53, %s1738_s1 }
 0x35f   :  { %v338_v54 = vpop.permute.xlu1 %337 }
 0x360   :  { %1471 = vmatmul.mubr.msk.bf16.vlgmr.msra.gmra.mxu0 %vm93_vm1, %v338_v54 }
 0x361   :  { %1483 = vmatpush3.bf16.msra.mxu0 %v1777_v11  ;;  %1486 = vmatprep.mubr.msk.bf16.mxu0 %vm1737_vm0, %v1736_v1 }
 0x362   :  { %1484 = vmatprep.subr.bf16.mxu0 %v1736_v1 }
 0x365   :  { %1485 = vmatpush3.bf16.msra.mxu0 %v1784_v14 }
 0x366   :  { %1498 = vmatprep.subr.bf16.mxu0 %v1736_v1 }
 0x420   :  { %v376_v55 = vpop.f32.mrf.mxu0 }
 0x421   :  { %v383_v56 = vrot.slane %v376_v55, 6 }
 0x422   :  { %v1472_v57 = vpop.f32.mrf.mxu0 }
 0x423   :  { %v385_v58 = vadd.f32 %v383_v56, %v1820_v33 }
 0x424   :  { %v379_v59 = vpop.f32.mrf.mxu0 }
 0x425   :  { %1613 = vtanh.f32 %v385_v58  ;;  %v1353_v62 = vmul.f32 -1.442695, %v385_v58 }
 0x426   :  { %v1473_v60 = vpop.f32.mrf.mxu0 }
 0x427   :  { %1615 = vpow2.f32 %v1353_v62 }
 0x432   :  { %v1614_v61 = vpop.eup %1613 }
 0x433   :  { %398 = vrot.lane.b32.xlu0 %v1614_v61, %s1739_s28 }
 0x434   :  { %v1616_v63 = vpop.eup %1615 }
 0x435   :  { %v389_v0 = vadd.f32 1.0, %v1616_v63 }
 0x437   :  { %1617 = vrcp.f32 %v389_v0 }
 0x444   :  { %v1618_v2 = vpop.eup %1617 }
 0x445   :  { %v396_v6 = vmul.f32 %v1618_v2, %v394_v5 }
 0x4a5   :  { %v399_v3 = vpop.permute.xlu0 %398 }
 0x4a6   :  { %v401_v4 = vmul.f32 %v1618_v2, %v399_v3 }
 0x4a8   :  { %403 = vrot.lane.b32.xlu1 %v401_v4, %s1738_s1 }
 0x51a   :  { %v404_v7 = vpop.permute.xlu1 %403 }
 0x51b   :  { %v406_v8 = vadd.f32 %v404_v7, %v396_v6 }
 0x51d   :  { %1619 = vtanh.f32 %v406_v8  ;;  %v473_v35 = vrot.slane %v406_v8, 6 }
 0x52a   :  { %v1620_v9 = vpop.eup %1619 }
 0x52b   :  { %409 = vrot.lane.b32.xlu0 %v1620_v9, %s1739_s28 }
 0x59d   :  { %v410_v10 = vpop.permute.xlu0 %409 }
 0x59e   :  { %v412_v12 = vmul.f32 %v1618_v2, %v410_v10 }
 0x5a0   :  { %v413_v13 = vpack.c.bf16 %v412_v12, %v412_v12  ;;  %v884_v42 = vsel %vm883_vm6, %v1826_v52, %v412_v12 }
 0x5a2   :  { %v415_v15 = vrot.slane %v413_v13, 1 }
 0x5a4   :  { %416 = vrot.lane.b32.xlu1 %v415_v15, %s1738_s1 }
 0x616   :  { %v417_v18 = vpop.permute.xlu1 %416 }
 0x617   :  { %1479 = vmatmul.mubr.msk.bf16.vlgmr.msra.gmra.mxu1 %vm93_vm1, %v417_v18 }
 0x618   :  { %1491 = vmatpush3.bf16.msra.mxu1 %v1777_v11  ;;  %1494 = vmatprep.mubr.msk.bf16.mxu1 %vm1737_vm0, %v1736_v1 }
 0x619   :  { %1492 = vmatprep.subr.bf16.mxu1 %v1736_v1 }
 0x61c   :  { %1493 = vmatpush3.bf16.msra.mxu1 %v1784_v14 }
 0x61d   :  { %1506 = vmatprep.subr.bf16.mxu1 %v1736_v1 }
 0x6d7   :  { %v455_v19 = vpop.f32.mrf.mxu1 }
 0x6d8   :  { %v462_v20 = vrot.slane %v455_v19, 4 }
 0x6d9   :  { %v1480_v21 = vpop.f32.mrf.mxu1 }
 0x6da   :  { %v464_v22 = vadd.f32 %v462_v20, %v1820_v33 }
 0x6db   :  { %v458_v23 = vpop.f32.mrf.mxu1 }
 0x6dc   :  { %1621 = vtanh.f32 %v464_v22  ;;  %v1355_v26 = vmul.f32 -1.442695, %v464_v22 }
 0x6dd   :  { %v1481_v24 = vpop.f32.mrf.mxu1 }
 0x6de   :  { %1623 = vpow2.f32 %v1355_v26 }
 0x6e9   :  { %v1622_v25 = vpop.eup %1621 }
 0x6ea   :  { %477 = vrot.lane.b32.xlu0 %v1622_v25, %s1739_s28 }
 0x6eb   :  { %v1624_v27 = vpop.eup %1623 }
 0x6ec   :  { %v468_v28 = vadd.f32 1.0, %v1624_v27 }
 0x6ee   :  { %1625 = vrcp.f32 %v468_v28 }
 0x6fb   :  { %v1626_v30 = vpop.eup %1625 }
 0x6fc   :  { %v475_v36 = vmul.f32 %v1626_v30, %v473_v35 }
 0x75c   :  { %v478_v32 = vpop.permute.xlu0 %477 }
 0x75d   :  { %v480_v34 = vmul.f32 %v1626_v30, %v478_v32 }
 0x75f   :  { %482 = vrot.lane.b32.xlu1 %v480_v34, %s1738_s1 }
 0x7d1   :  { %v483_v37 = vpop.permute.xlu1 %482 }
 0x7d2   :  { %v485_v38 = vadd.f32 %v483_v37, %v475_v36 }
 0x7d4   :  { %1627 = vtanh.f32 %v485_v38  ;;  %v552_v60 = vrot.slane %v485_v38, 6 }
 0x7e1   :  { %v1628_v39 = vpop.eup %1627 }
 0x7e2   :  { %488 = vrot.lane.b32.xlu0 %v1628_v39, %s1739_s28 }
 0x854   :  { %v489_v40 = vpop.permute.xlu0 %488 }
 0x855   :  { %v491_v41 = vmul.f32 %v1626_v30, %v489_v40 }
 0x857   :  { %v492_v43 = vpack.c.bf16 %v491_v41, %v491_v41  ;;  %v886_v44 = vsel %vm885_vm7, %v884_v42, %v491_v41 }
 0x859   :  { %v494_v45 = vrot.slane %v492_v43, 2 }
 0x85b   :  { %495 = vrot.lane.b32.xlu1 %v494_v45, %s1738_s1 }
 0x8cd   :  { %v496_v46 = vpop.permute.xlu1 %495 }
 0x8ce   :  { %1487 = vmatmul.mubr.msk.bf16.vlgmr.msra.gmra.mxu0 %vm93_vm1, %v496_v46 }
 0x8cf   :  { %1499 = vmatpush3.bf16.msra.mxu0 %v1777_v11  ;;  %1502 = vmatprep.mubr.msk.bf16.mxu0 %vm1737_vm0, %v1736_v1 }
 0x8d0   :  { %1500 = vmatprep.subr.bf16.mxu0 %v1736_v1 }
 0x8d3   :  { %1501 = vmatpush3.bf16.msra.mxu0 %v1784_v14 }
 0x8d4   :  { %1514 = vmatprep.subr.bf16.mxu0 %v1736_v1 }
 0x98e   :  { %v534_v47 = vpop.f32.mrf.mxu0 }
 0x98f   :  { %v541_v48 = vrot.slane %v534_v47, 2 }
 0x990   :  { %v1488_v49 = vpop.f32.mrf.mxu0 }
 0x991   :  { %v543_v50 = vadd.f32 %v541_v48, %v1820_v33 }
 0x992   :  { %v537_v51 = vpop.f32.mrf.mxu0 }
 0x993   :  { %1629 = vtanh.f32 %v543_v50  ;;  %v1357_v54 = vmul.f32 -1.442695, %v543_v50 }
 0x994   :  { %v1489_v52 = vpop.f32.mrf.mxu0 }
 0x995   :  { %1631 = vpow2.f32 %v1357_v54 }
 0x9a0   :  { %v1630_v53 = vpop.eup %1629 }
 0x9a1   :  { %556 = vrot.lane.b32.xlu0 %v1630_v53, %s1739_s28 }
 0x9a2   :  { %v1632_v55 = vpop.eup %1631 }
 0x9a3   :  { %v547_v56 = vadd.f32 1.0, %v1632_v55 }
 0x9a5   :  { %1633 = vrcp.f32 %v547_v56 }
 0x9b2   :  { %v1634_v57 = vpop.eup %1633 }
 0x9b3   :  { %v554_v61 = vmul.f32 %v1634_v57, %v552_v60 }
 0xa13   :  { %v557_v58 = vpop.permute.xlu0 %556 }
 0xa14   :  { %v559_v59 = vmul.f32 %v1634_v57, %v557_v58 }
 0xa16   :  { %561 = vrot.lane.b32.xlu1 %v559_v59, %s1738_s1 }
 0xa88   :  { %v562_v62 = vpop.permute.xlu1 %561 }
 0xa89   :  { %v564_v33 = vadd.f32 %v562_v62, %v554_v61 }
 0xa8b   :  { %1635 = vtanh.f32 %v564_v33  ;;  %v628_v23 = vrot.slane %v564_v33, 6 }
 0xa98   :  { %v1636_v63 = vpop.eup %1635 }
 0xa99   :  { %567 = vrot.lane.b32.xlu0 %v1636_v63, %s1739_s28 }
 0xb0b   :  { %v568_v0 = vpop.permute.xlu0 %567 }
 0xb0c   :  { %v570_v2 = vmul.f32 %v1634_v57, %v568_v0 }
 0xb0e   :  { %v571_v3 = vpack.c.bf16 %v570_v2, %v570_v2  ;;  %v1870_v4 = vsel %vm887_vm8, %v886_v44, %v570_v2 }
 0xb10   :  { %v573_v5 = vrot.slane %v571_v3, 3 }
 0xb12   :  { %574 = vrot.lane.b32.xlu1 %v573_v5, %s1738_s1 }
 0xb84   :  { %v575_v6 = vpop.permute.xlu1 %574 }
 0xb85   :  { %1495 = vmatmul.mubr.msk.bf16.vlgmr.msra.gmra.mxu1 %vm93_vm1, %v575_v6 }
 0xb86   :  { %1507 = vmatpush3.bf16.msra.mxu1 %v1777_v11  ;;  %1510 = vmatprep.mubr.msk.bf16.mxu1 %vm1737_vm0, %v1736_v1 }
 0xb87   :  { %1508 = vmatprep.subr.bf16.mxu1 %v1736_v1 }
 0xb8a   :  { %1509 = vmatpush3.bf16.msra.mxu1 %v1784_v14 }
 0xb8b   :  { %1522 = vmatprep.subr.mxu1 %v1736_v1 }
 0xc45   :  { %v613_v7 = vpop.f32.mrf.mxu1 }
 0xc46   :  { %v619_v8 = vadd.f32 %v613_v7, %v1816_v29 }
 0xc47   :  { %v1496_v9 = vpop.f32.mrf.mxu1 }
 0xc48   :  { %1637 = vtanh.f32 %v619_v8  ;;  %v1359_v15 = vmul.f32 -1.442695, %v619_v8 }
 0xc49   :  { %v616_v10 = vpop.f32.mrf.mxu1 }
 0xc4a   :  { %1639 = vpow2.f32 %v1359_v15 }
 0xc4b   :  { %v1497_v12 = vpop.f32.mrf.mxu1 }
 0xc55   :  { %v1638_v13 = vpop.eup %1637 }
 0xc56   :  { %632 = vrot.lane.b32.xlu0 %v1638_v13, %s1739_s28 }
 0xc57   :  { %v1640_v18 = vpop.eup %1639 }
 0xc58   :  { %v623_v19 = vadd.f32 1.0, %v1640_v18 }
 0xc5a   :  { %1641 = vrcp.f32 %v623_v19 }
 0xc67   :  { %v1642_v20 = vpop.eup %1641 }
 0xc68   :  { %v630_v24 = vmul.f32 %v1642_v20, %v628_v23 }
 0xcc8   :  { %v633_v21 = vpop.permute.xlu0 %632 }
 0xcc9   :  { %v635_v22 = vmul.f32 %v1642_v20, %v633_v21 }
 0xccb   :  { %637 = vrot.lane.b32.xlu1 %v635_v22, %s1738_s1 }
 0xd3d   :  { %v638_v25 = vpop.permute.xlu1 %637 }
 0xd3e   :  { %v640_v26 = vadd.f32 %v638_v25, %v630_v24 }
 0xd40   :  { %1643 = vtanh.f32 %v640_v26  ;;  %v706_v46 = vrot.slane %v640_v26, 6 }
 0xd4d   :  { %v1644_v27 = vpop.eup %1643 }
 0xd4e   :  { %643 = vrot.lane.b32.xlu0 %v1644_v27, %s1739_s28 }
 0xdc0   :  { %v644_v28 = vpop.permute.xlu0 %643 }
 0xdc1   :  { %v1884_v30 = vmul.f32 %v1642_v20, %v644_v28 }
 0xdc3   :  { %v647_v32 = vpack.c.bf16 %v1884_v30, %v1884_v30 }
 0xdc5   :  { %649 = vrot.lane.b32.xlu1 %v647_v32, %s1738_s1 }
 0xe37   :  { %v650_v34 = vpop.permute.xlu1 %649 }
 0xe38   :  { %1503 = vmatmul.mubr.msk.bf16.vlgmr.msra.gmra.mxu0 %vm93_vm1, %v650_v34 }
 0xe39   :  { %1515 = vmatpush3.bf16.msra.mxu0 %v1777_v11  ;;  %1518 = vmatprep.mubr.msk.bf16.mxu0 %vm1737_vm0, %v1736_v1 }
 0xe3a   :  { %1516 = vmatprep.subr.bf16.mxu0 %v1736_v1 }
 0xe3d   :  { %1517 = vmatpush3.bf16.msra.mxu0 %v1784_v14 }
 0xe3e   :  { %1536 = vmatprep.subr.mxu0 %v1736_v1 }
 0xef8   :  { %v688_v35 = vpop.f32.mrf.mxu0 }
 0xef9   :  { %v695_v36 = vrot.slane %v688_v35, 6 }
 0xefa   :  { %v1504_v37 = vpop.f32.mrf.mxu0 }
 0xefb   :  { %v697_v38 = vadd.f32 %v695_v36, %v1816_v29 }
 0xefc   :  { %v691_v39 = vpop.f32.mrf.mxu0 }
 0xefd   :  { %1645 = vtanh.f32 %v697_v38  ;;  %v1361_v11 = vmul.f32 -1.442695, %v697_v38  ;;  %v893_v38 = vshrl.u32 %v75_v16, 7 }
 0xefe   :  { %v1505_v40 = vpop.f32.mrf.mxu0 }
 0xeff   :  { %1647 = vpow2.f32 %v1361_v11 }
 0xf0a   :  { %v1646_v41 = vpop.eup %1645 }
 0xf0b   :  { %710 = vrot.lane.b32.xlu0 %v1646_v41, %s1739_s28  ;;  %v897_v41 = vand.u32 1, %v893_v38 }
 0xf0c   :  { %v1648_v42 = vpop.eup %1647 }
 0xf0d   :  { %v701_v43 = vadd.f32 1.0, %v1648_v42  ;;  %vm899_vm9 = vcmp.eq.s32.totalorder %v897_v41, 0  ;;  %v902_v42 = vstv %s901_s29  ;;  %vm905_vm10 = vcmp.eq.s32.totalorder %v897_v41, 1 }
 0xf0f   :  { %1649 = vrcp.f32 %v701_v43  ;;  %v903_v43 = vsel %vm899_vm9, %v902_v42, 0 }
 0xf1c   :  { %v1650_v44 = vpop.eup %1649 }
 0xf1d   :  { %v708_v47 = vmul.f32 %v1650_v44, %v706_v46 }
 0xf7d   :  { %v711_v14 = vpop.permute.xlu0 %710 }
 0xf7e   :  { %v713_v45 = vmul.f32 %v1650_v44, %v711_v14  ;;  %v895_v14 = vshra.s32 %v893_v38, 1 }
 0xf80   :  { %715 = vrot.lane.b32.xlu1 %v713_v45, %s1738_s1 }
 0xff2   :  { %v716_v48 = vpop.permute.xlu1 %715 }
 0xff3   :  { %v718_v49 = vadd.f32 %v716_v48, %v708_v47  ;;  %v894_v48 = vadd.s32 8, %v893_v38  ;;  %v62_v38 = vld [vmem:[#allocation4 + $0xe0] sm:$0xff] }
 0xff5   :  { %1651 = vtanh.f32 %v718_v49  ;;  %v785_v6 = vrot.slane %v718_v49, 6  ;;  %v898_v49 = vand.u32 1, %v894_v48 }
 0xff7   :  { %vm900_vm12 = vcmp.eq.s32.totalorder %v898_v49, 0  ;;  %vm906_vm13 = vcmp.eq.s32.totalorder %v898_v49, 1 }
0x1002   :  { %v1652_v50 = vpop.eup %1651 }
0x1003   :  { %721 = vrot.lane.b32.xlu0 %v1652_v50, %s1739_s28  ;;  %v904_v50 = vsel %vm900_vm12, %v902_v42, 0 }
0x1075   :  { %v722_v51 = vpop.permute.xlu0 %721 }
0x1076   :  { %v724_v52 = vmul.f32 %v1650_v44, %v722_v51  ;;  %v908_v44 = vstv %s1366_s30  ;;  %v896_v51 = vshra.s32 %v894_v48, 1 }
0x1077   :  { %v909_v45 = vsel %vm905_vm10, %v908_v44, %v903_v43  ;;  %v55_v43 = vld [vmem:[#allocation4 + $0xa8] sm:$0xff] }
0x1078   :  { %v725_v53 = vpack.c.bf16 %v724_v52, %v724_v52  ;;  %v889_v15 = vsel %vm883_vm6, %v1884_v30, %v724_v52  ;;  %vm911_vm11 = vcmp.lt.s32.totalorder %v895_v14, %v909_v45  ;;  %v910_v52 = vsel %vm906_vm13, %v908_v44, %v904_v50  ;;  %v1375_v45 = vld [vmem:[#allocation4 + $0x98] ss:$0 sm:$0xff] }
0x1079   :  { %v1367_v47 = vsel %vm911_vm11, 1.0, %v1736_v1  ;;  %vm912_vm14 = vcmp.lt.s32.totalorder %v896_v51, %v910_v52  ;;  %vm1012_vm6 = vcmask 125952   ;;  %v1376_v51 = vld [vmem:[#allocation4 + $0x120] ss:$0 sm:$0xff] }
0x107a   :  { %v727_v54 = vrot.slane %v725_v53, 1  ;;  %v917_v16 = vmul.f32 %v1367_v47, %v1870_v4 }
0x107c   :  { %728 = vrot.lane.b32.xlu1 %v727_v54, %s1738_s1 }
0x10ee   :  { %v729_v55 = vpop.permute.xlu1 %728 }
0x10ef   :  { %1511 = vmatmul.mubr.msk.bf16.vlgmr.msra.gmra.mxu1 %vm93_vm1, %v729_v55  ;;  %v1368_v55 = vsel %vm912_vm14, 1.0, %v1736_v1 }
0x10f0   :  { %1526 = vmatprep.mubr.msk.f32.mxu1 %vm1737_vm0, %v1736_v1 }
0x11af   :  { %v767_v56 = vpop.f32.mrf.mxu1 }
0x11b0   :  { %v774_v57 = vrot.slane %v767_v56, 4 }
0x11b1   :  { %v1512_v58 = vpop.f32.mrf.mxu1 }
0x11b2   :  { %v776_v59 = vadd.f32 %v774_v57, %v1816_v29  ;;  %v1348_v58 = vld [vmem:[#allocation4 + $0x50] ss:$0 sm:$0xff] }
0x11b3   :  { %v770_v60 = vpop.f32.mrf.mxu1 }
0x11b4   :  { %1653 = vtanh.f32 %v776_v59  ;;  %v1363_v33 = vmul.f32 -1.442695, %v776_v59  ;;  %v257_v60 = vadd.f32 %v1348_v58, %v1818_v31  ;;  %v919_v31 = vshra.s32 %v1790_v17, 1 }
0x11b5   :  { %v1513_v61 = vpop.f32.mrf.mxu1 }
0x11b6   :  { %1655 = vpow2.f32 %v1363_v33  ;;  %v920_v61 = vand.u32 1, %v1790_v17  ;;  %v52_v17 = vld [vmem:[#allocation4 + $0x90] sm:$0xff] }
0x11b8   :  { %vm921_vm15 = vcmp.eq.s32.totalorder %v920_v61, 0  ;;  %vm923_vm2 = vcmp.eq.s32.totalorder %v920_v61, 1  ;;  %vm925_vm3 = vcmp.ne.s32.totalorder %v920_v61, %v897_v41  ;;  %v58_v41 = vld [vmem:[#allocation4 + $0xc0] sm:$0xff] }
0x11c1   :  { %v1654_v62 = vpop.eup %1653 }
0x11c2   :  { %789 = vrot.lane.b32.xlu0 %v1654_v62, %s1739_s28  ;;  %v922_v62 = vsel %vm921_vm15, %v902_v42, 0  ;;  %v56_v42 = vld [vmem:[#allocation4 + $0xb0] sm:$0xff] }
0x11c3   :  { %v1656_v63 = vpop.eup %1655  ;;  %v924_v33 = vsel %vm923_vm2, %v908_v44, %v922_v62  ;;  %v54_v44 = vld [vmem:[#allocation4 + $0xa0] sm:$0xff] }
0x11c4   :  { %v780_v0 = vadd.f32 1.0, %v1656_v63  ;;  %vm926_vm4 = vcmp.ge.s32.totalorder %v919_v31, %v924_v33 }
0x11c5   :  { %vm927_vm5 = vmor %vm925_vm3, %vm926_vm4 }
0x11c6   :  { %1657 = vrcp.f32 %v780_v0  ;;  %v928_v63 = vsel %vm927_vm5, -1e+09, %v1736_v1 }
0x11d3   :  { %v1658_v2 = vpop.eup %1657 }
0x11d4   :  { %v787_v7 = vmul.f32 %v1658_v2, %v785_v6 }
0x1234   :  { %v790_v3 = vpop.permute.xlu0 %789 }
0x1235   :  { %v792_v5 = vmul.f32 %v1658_v2, %v790_v3 }
0x1237   :  { %794 = vrot.lane.b32.xlu1 %v792_v5, %s1738_s1 }
0x12a9   :  { %v795_v8 = vpop.permute.xlu1 %794 }
0x12aa   :  { %v797_v9 = vadd.f32 %v795_v8, %v787_v7 }
0x12ac   :  { %1659 = vtanh.f32 %v797_v9 }
0x12b9   :  { %v1660_v10 = vpop.eup %1659 }
0x12ba   :  { %800 = vrot.lane.b32.xlu0 %v1660_v10, %s1739_s28 }
0x132c   :  { %v801_v12 = vpop.permute.xlu0 %800 }
0x132d   :  { %v803_v13 = vmul.f32 %v1658_v2, %v801_v12  ;;  %v51_v12 = vld [vmem:[#allocation4 + $0x88] sm:$0xff] }
0x132f   :  { %v804_v18 = vpack.c.bf16 %v803_v13, %v803_v13  ;;  %v890_v19 = vsel %vm885_vm7, %v889_v15, %v803_v13  ;;  %vm1026_vm7 = vcmask 130048  }
0x1331   :  { %v806_v20 = vrot.slane %v804_v18, 2 }
0x1333   :  { %807 = vrot.lane.b32.xlu1 %v806_v20, %s1738_s1  ;;  %v47_v20 = vld [vmem:[#allocation4 + $0x68] sm:$0xff] }
0x13a5   :  { %v808_v21 = vpop.permute.xlu1 %807 }
0x13a6   :  { %1519 = vmatmul.mubr.msk.bf16.vlgmr.msra.gmra.mxu0 %vm93_vm1, %v808_v21  ;;  %v46_v21 = vld [vmem:[#allocation4 + $0x60] sm:$0xff] }
0x13a7   :  { %1544 = vmatprep.mubr.msk.f32.mxu0 %vm1737_vm0, %v1736_v1  ;;  %1537 = vmatpush3.msra.mxu0 %v52_v17 }
0x13a8   :  { %1538 = vmatprep.subr.mxu0 %v1736_v1 }
0x13a9   :  { %1539 = vmatpush3.msra.mxu0 %v51_v12 }
0x13aa   :  { %1540 = vmatprep.subr.mxu0 %v1736_v1 }
0x1466   :  { %v846_v22 = vpop.f32.mrf.mxu0 }
0x1467   :  { %v853_v23 = vrot.slane %v846_v22, 2  ;;  %v50_v22 = vld [vmem:[#allocation4 + $0x80] sm:$0xff] }
0x1468   :  { %v1520_v24 = vpop.f32.mrf.mxu0  ;;  %1541 = vmatpush3.msra.mxu0 %v50_v22 }
0x1469   :  { %v855_v25 = vadd.f32 %v853_v23, %v1816_v29  ;;  %v864_v29 = vrot.slane %v797_v9, 6  ;;  %v45_v23 = vld [vmem:[#allocation4 + $0x58] sm:$0xff]  ;;  %1542 = vmatprep.subr.mxu0 %v1736_v1 }
0x146a   :  { %v849_v26 = vpop.f32.mrf.mxu0  ;;  %v49_v24 = vld [vmem:[#allocation4 + $0x78] sm:$0xff] }
0x146b   :  { %1661 = vtanh.f32 %v855_v25  ;;  %v1365_v30 = vmul.f32 -1.442695, %v855_v25  ;;  %1543 = vmatpush3.msra.mxu0 %v49_v24 }
0x146c   :  { %v1521_v27 = vpop.f32.mrf.mxu0  ;;  %1558 = vmatprep.subr.mxu0 %v1736_v1 }
0x146d   :  { %1663 = vpow2.f32 %v1365_v30  ;;  %v69_v27 = vld [vmem:[#allocation4 + $0x118] sm:$0xff]  ;;  %v68_v30 = vld [vmem:[#allocation4 + $0x110] sm:$0xff] }
0x1478   :  { %v1662_v28 = vpop.eup %1661 }
0x1479   :  { %868 = vrot.lane.b32.xlu0 %v1662_v28, %s1739_s28 }
0x147a   :  { %v1664_v32 = vpop.eup %1663 }
0x147b   :  { %v859_v34 = vadd.f32 1.0, %v1664_v32  ;;  %v67_v32 = vld [vmem:[#allocation4 + $0x108] sm:$0xff] }
0x147d   :  { %1665 = vrcp.f32 %v859_v34  ;;  %v66_v34 = vld [vmem:[#allocation4 + $0x100] sm:$0xff] }
0x148a   :  { %v1666_v35 = vpop.eup %1665 }
0x148b   :  { %v866_v39 = vmul.f32 %v1666_v35, %v864_v29  ;;  %v61_v29 = vld [vmem:[#allocation4 + $0xd8] sm:$0xff] }
0x14eb   :  { %v869_v36 = vpop.permute.xlu0 %868 }
0x14ec   :  { %v871_v37 = vmul.f32 %v1666_v35, %v869_v36  ;;  %v64_v36 = vld [vmem:[#allocation4 + $0xf0] sm:$0xff] }
0x14ee   :  { %873 = vrot.lane.b32.xlu1 %v871_v37, %s1738_s1  ;;  %v63_v37 = vld [vmem:[#allocation4 + $0xe8] sm:$0xff] }
0x1560   :  { %v874_v40 = vpop.permute.xlu1 %873 }
0x1561   :  { %v876_v11 = vadd.f32 %v874_v40, %v866_v39  ;;  %v60_v39 = vld [vmem:[#allocation4 + $0xd0] sm:$0xff]  ;;  %v59_v40 = vld [vmem:[#allocation4 + $0xc8] sm:$0xff] }
0x1563   :  { %1667 = vtanh.f32 %v876_v11  ;;  %v57_v11 = vld [vmem:[#allocation4 + $0xb8] sm:$0xff] }
0x1570   :  { %v1668_v46 = vpop.eup %1667 }
0x1571   :  { %879 = vrot.lane.b32.xlu0 %v1668_v46, %s1739_s28 }
0x1575   :  { %931 = vrot.lane.b32.xlu0 %v917_v16, %s1738_s1 }
0x15e3   :  { %v880_v53 = vpop.permute.xlu0 %879 }
0x15e4   :  { %v882_v54 = vmul.f32 %v1666_v35, %v880_v53  ;;  %v65_v35 = vld [vmem:[#allocation4 + $0xf8] sm:$0xff] }
0x15e6   :  { %v891_v56 = vsel %vm887_vm8, %v890_v19, %v882_v54  ;;  %v48_v19 = vld [vmem:[#allocation4 + $0x70] sm:$0xff] }
0x15e7   :  { %v918_v57 = vmul.f32 %v1368_v55, %v891_v56  ;;  %v932_v59 = vpop.permute.xlu0 %931 }
0x15e9   :  { %933 = vrot.lane.b32.xlu1 %v918_v57, %s1738_s1 }
0x165b   :  { %v934_v4 = vpop.permute.xlu1 %933 }
0x165c   :  { %1523 = vmatpush3.xpose.msk.msra.mxu1 %vm93_vm1, %v934_v4 }
0x165d   :  { %1524 = vmatprep.subr.mxu1 %v1736_v1 }
0x1660   :  { %1525 = vmatpush3.xpose.msk.msra.mxu1 %vm93_vm1, %v932_v59 }
0x1661   :  { %1529 = vmatprep.subr.mxu1 %v1736_v1 }
0x1663   :  { %1527 = vmatmul.mubr.msk.f32.vlgmr.msra.gmra.mxu1 %vm93_vm1, %v257_v60 }
0x1664   :  { %1530 = vmatpush3.msra.mxu1 %v934_v4  ;;  %1533 = vmatprep.mubr.msk.f32.mxu1 %vm1737_vm0, %v1736_v1 }
0x1665   :  { %1531 = vmatprep.subr.mxu1 %v1736_v1 }
0x1666   :  { %1532 = vmatpush3.msra.mxu1 %v932_v59 }
0x1667   :  { %1547 = vmatprep.subr.mxu1 %v1736_v1 }
0x1723   :  { %v1008_v0 = vpop.f32.mrf.mxu1 }
0x1724   :  { %v1009_v2 = vadd.f32 %v1008_v0, %v928_v63 }
0x1725   :  { %v1528_v3 = vpop.f32.mrf.mxu1 }
0x1726   :  { %v1013_v5 = vsel %vm1012_vm6, %v1009_v2, -inf }
0x1727   :  { %1014 = vmax.xlane.f32.xlu1 %v1013_v5 }
0x17b0   :  { %v1015_v6 = vpop.xlane.xlu1 %1014 }
0x17b1   :  { %v1016_v7 = vsub.f32 %v1009_v2, %v1015_v6 }
0x17b3   :  { %v1017_v8 = vmul.f32 1.442695, %v1016_v7 }
0x17b5   :  { %1669 = vpow2.f32 %v1017_v8 }
0x17c2   :  { %v1670_v9 = vpop.eup %1669 }
0x17c3   :  { %v1019_v10 = vsel %vm1012_vm6, %v1670_v9, 0.0 }
0x17c4   :  { %1020 = vadd.xlane.f32.xlu0 %v1019_v10 }
0x184d   :  { %v1021_v13 = vpop.xlane.xlu0 %1020 }
0x184e   :  { %1671 = vrcp.f32 %v1021_v13 }
0x185b   :  { %v1672_v15 = vpop.eup %1671 }
0x185c   :  { %v1023_v18 = vmul.f32 %v1672_v15, %v1670_v9 }
0x185e   :  { %1534 = vmatmul.mubr.msk.f32.vlgmr.msra.gmra.mxu1 %vm1026_vm7, %v1023_v18 }
0x185f   :  { %1548 = vmatpush3.msra.mxu1 %v48_v19  ;;  %1555 = vmatprep.mubr.msk.f32.mxu1 %vm1737_vm0, %v1736_v1 }
0x1860   :  { %1549 = vmatprep.subr.mxu1 %v1736_v1 }
0x1861   :  { %1550 = vmatpush3.msra.mxu1 %v47_v20 }
0x1862   :  { %1551 = vmatprep.subr.mxu1 %v1736_v1 }
0x1863   :  { %1552 = vmatpush3.msra.mxu1 %v46_v21 }
0x1864   :  { %1553 = vmatprep.subr.mxu1 %v1736_v1 }
0x1865   :  { %1554 = vmatpush3.msra.mxu1 %v45_v23 }
0x191e   :  { %v1096_v25 = vpop.f32.mrf.mxu1 }
0x191f   :  { %v1101_v26 = vrot.slane %v1096_v25, 2  ;;  %1556 = vmatmul.mubr.msk.f32.vlgmr.msra.gmra.mxu1 %vm93_vm1, %v1096_v25 }
0x1920   :  { %v1535_v28 = vpop.f32.mrf.mxu1 }
0x1921   :  { %1545 = vmatmul.mubr.msk.f32.vlgmr.msra.gmra.mxu0 %vm93_vm1, %v1101_v26 }
0x1922   :  { %1559 = vmatpush3.msra.mxu0 %v69_v27  ;;  %1590 = vmatprep.mubr.msk.f32.mxu0 %vm1737_vm0, %v1736_v1 }
0x1923   :  { %1560 = vmatprep.subr.mxu0 %v1736_v1 }
0x1924   :  { %1561 = vmatpush3.msra.mxu0 %v68_v30 }
0x1925   :  { %1562 = vmatprep.subr.mxu0 %v1736_v1 }
0x1926   :  { %1563 = vmatpush3.msra.mxu0 %v67_v32 }
0x1927   :  { %1564 = vmatprep.subr.mxu0 %v1736_v1 }
0x1928   :  { %1565 = vmatpush3.msra.mxu0 %v66_v34 }
0x1929   :  { %1566 = vmatprep.subr.mxu0 %v1736_v1 }
0x192a   :  { %1567 = vmatpush3.msra.mxu0 %v65_v35 }
0x192b   :  { %1568 = vmatprep.subr.mxu0 %v1736_v1 }
0x192c   :  { %1569 = vmatpush3.msra.mxu0 %v64_v36 }
0x192d   :  { %1570 = vmatprep.subr.mxu0 %v1736_v1 }
0x192e   :  { %1571 = vmatpush3.msra.mxu0 %v63_v37 }
0x192f   :  { %1572 = vmatprep.subr.mxu0 %v1736_v1 }
0x1930   :  { %1573 = vmatpush3.msra.mxu0 %v62_v38 }
0x1931   :  { %1574 = vmatprep.subr.mxu0 %v1736_v1 }
0x1932   :  { %1575 = vmatpush3.msra.mxu0 %v61_v29 }
0x1933   :  { %1576 = vmatprep.subr.mxu0 %v1736_v1 }
0x1934   :  { %1577 = vmatpush3.msra.mxu0 %v60_v39 }
0x1935   :  { %1578 = vmatprep.subr.mxu0 %v1736_v1 }
0x1936   :  { %1579 = vmatpush3.msra.mxu0 %v59_v40 }
0x1937   :  { %1580 = vmatprep.subr.mxu0 %v1736_v1 }
0x1938   :  { %1581 = vmatpush3.msra.mxu0 %v58_v41 }
0x1939   :  { %1582 = vmatprep.subr.mxu0 %v1736_v1 }
0x193a   :  { %1583 = vmatpush3.msra.mxu0 %v57_v11 }
0x193b   :  { %1584 = vmatprep.subr.mxu0 %v1736_v1 }
0x193c   :  { %1585 = vmatpush3.msra.mxu0 %v56_v42 }
0x193d   :  { %1586 = vmatprep.subr.mxu0 %v1736_v1 }
0x193e   :  { %1587 = vmatpush3.msra.mxu0 %v55_v43 }
0x193f   :  { %1588 = vmatprep.subr.mxu0 %v1736_v1 }
0x1940   :  { %1589 = vmatpush3.msra.mxu0 %v54_v44 }
0x19df   :  { %v1242_v14 = vpop.f32.mrf.mxu1 }
0x19e1   :  { %v1170_v46 = vpop.f32.mrf.mxu0  ;;  %v1557_v47 = vpop.f32.mrf.mxu1 }
0x19e2   :  { %v1243_v16 = vadd.f32 %v1242_v14, %v1170_v46 }
0x19e3   :  { %v1546_v48 = vpop.f32.mrf.mxu0 }
0x19e4   :  { %v1250_v49 = vadd.f32 %v1375_v45, %v1243_v16 }
0x19e6   :  { %v1251_v50 = vmax.f32 %v1250_v49, 0.0 }
0x19e8   :  { %1591 = vmatmul.mubr.f32.vlgmr.msra.gmra.mxu0 %v1251_v50 }
0x1aa8   :  { %v1322_v52 = vpop.f32.mrf.mxu0 }
0x1aa9   :  { %v1323_v53 = vadd.f32 %v1376_v51, %v1322_v52 }
0x1aaa   :  { %v1592_v54 = vpop.f32.mrf.mxu0 }
0x1aab   :  { %1326 = vst [vmem:[#allocation7] sm:$0x3] %v1323_v53 }
0x1aac   :  { %1716 = shalt.err (!%p1713_p0)
}
0x1aad   :  { %1336 = dma.vmem_to_hbm [thread:$0]  %s1334_s5, 32, %s1973_s3, [#allocation6]  }
0x1aae   :  { %1729 = dma.done.wait [#allocation6], 32  }
0x1aaf   :  { %1730 = vsyncadd [#allocation6], 4294967264 }
0x1ab0   :  { %1340 = vsyncpa [#allocation5], 1 }
0x1ab1   :  { %1341 = vsyncpa [#allocation6], 1 }

</bundles_post_ra>
